<compile_context>
chip_gen: v5e
topology: v5e:2x2
jax: 0.10.0
libtpu: 0.0.40
codegen_flags: <defaults>
</compile_context>

<pallas_src>
import jax
import jax.numpy as jnp
import numpy as np
from jax import lax
from jax.experimental import pallas as pl
from jax.experimental.pallas import tpu as pltpu

_BIG = 1e30                                  # finite "infinity": safe in f32 (2*_BIG < f32 max)
_PAD_LABEL = int(jnp.iinfo(jnp.int32).min)   # label that never matches a real label


def _round_up(x, m):
    return (x + m - 1) // m * m


def _make_triplet_kernel(margin: float, tile: int):
    margin_f = float(margin)
    nslab = tile // 128

    def kernel(xr_ref, xc_ref, sqr_ref, hsqc_ref, tr_ref, tc_ref, rv_ref,
               o_ref, max_ref, min_ref):
        j = pl.program_id(1)

        @pl.when(j == 0)
        def _init():
            max_ref[...] = jnp.full_like(max_ref, -_BIG)
            min_ref[...] = jnp.full_like(min_ref, _BIG)

        # Gram block on the MXU: contract the feature (last) dim of both operands
        # directly (A @ B^T form), bf16 operands, f32 accumulation, no transposes.
        gram = lax.dot_general(
            xr_ref[...], xc_ref[...],
            dimension_numbers=(((1,), (1,)), ((), ())),
            preferred_element_type=jnp.float32)                   # (tile, tile) f32

        # Column-side scalars for this column tile: resident in VMEM, sliced along
        # the first (sublane) axis -> no per-step DMA.
        hsq_c = hsqc_ref[pl.ds(j, 1), :]                          # (1, tile) f32
        t_c = tc_ref[pl.ds(j, 1), :]                              # (1, tile) i32

        # Monotone surrogate of the squared distance:
        #   dist2[i, c] = sq_row[i] + 2 * h[i, c],   h = 0.5*sq_col[c] - gram[i, c]
        # so per-row max/min over h equals max/min over dist2 (sqrt deferred too).
        h = hsq_c - gram                                          # (tile, tile) f32
        same = tr_ref[...] == t_c                                 # (tile, tile) bool
        pos = jnp.where(same, h, -_BIG)    # hardest-positive candidates
        neg = jnp.where(same, _BIG, h)     # hardest-negative candidates

        # Lane-dense running reduction: pure element-wise max/min per 128-lane slab
        # (VPU only); the cross-lane reduce is deferred to the finalize.
        mx = max_ref[...]
        mn = min_ref[...]
        for s in range(nslab):                                    # static unroll
            sl = slice(s * 128, (s + 1) * 128)
            mx = jnp.maximum(mx, pos[:, sl])
            mn = jnp.minimum(mn, neg[:, sl])
        max_ref[...] = mx
        min_ref[...] = mn

        @pl.when(j == pl.num_programs(1) - 1)
        def _finalize():
            # Single 128 -> 1 cross-lane reduce per row tile, then the cheap
            # (tile, 1) epilogue: undo the surrogate, clamp, sqrt, hinge, mask.
            h_ap = jnp.max(max_ref[...], axis=1, keepdims=True)   # (tile, 1)
            h_an = jnp.min(min_ref[...], axis=1, keepdims=True)   # (tile, 1)
            sq_r = sqr_ref[...]
            d_ap = jnp.sqrt(jnp.maximum(sq_r + 2.0 * h_ap, 1e-12))
            d_an = jnp.sqrt(jnp.maximum(sq_r + 2.0 * h_an, 1e-12))
            o_ref[...] = jnp.maximum(d_ap - d_an + margin_f, 0.0) * rv_ref[...]

    return kernel


def _select_config(d_pad: int, mm_itemsize: int):
    """Generation-aware tile size, scoped-VMEM limit and column-stream buffer depth."""
    try:
        cap = int(pltpu.get_tpu_info().vmem_capacity_bytes)   # 128 MiB v5e/v6e, 64 MiB v7x
    except Exception:
        cap = 64 * 1024 * 1024                                # conservative fallback (v7x per-TC)
    vmem_limit = int(min((cap * 3) // 4, 96 * 1024 * 1024))
    budget = (vmem_limit * 4) // 5

    col_bufs = 3 if d_pad <= 1024 else 2   # deeper pipelining when per-tile compute is short
    tile = 128
    for cand in (512, 256, 128):           # 256-multiples feed the 2x256^2 MXU; 128 is the floor
        need = ((2 + col_bufs) * cand * d_pad * mm_itemsize   # x row (2x) + x col (col_bufs x)
                + 4 * cand * cand * 4                          # gram / h / masked intermediates
                + 2 * cand * 128 * 4                           # lane-dense running accumulators
                + (1 << 20))                                   # small vectors + slack
        if need <= budget:
            tile = cand
            break
    return tile, vmem_limit, col_bufs


def triplet_loss(inputs, targets, margin: float = 1.0, block=None,
                 matmul_dtype=jnp.bfloat16):
    """inputs: (N, D) float features, targets: (N,) int labels -> scalar f32 loss."""
    n, d = inputs.shape
    d_pad = _round_up(d, 128)                       # lane-dense contraction dim
    mm_itemsize = jnp.dtype(matmul_dtype).itemsize

    tile, vmem_limit, col_bufs = _select_config(d_pad, mm_itemsize)
    if block is not None:
        tile = int(block)
    tile = min(tile, _round_up(n, 128))             # don't pad tiny batches up to a huge tile
    assert tile % 128 == 0, "tile must be a multiple of 128"
    n_pad = _round_up(n, tile)
    num_i = n_pad // tile
    num_j = n_pad // tile

    x = inputs.astype(jnp.float32)
    if d_pad != d:
        x = jnp.pad(x, ((0, 0), (0, d_pad - d)))
    if n_pad != n:
        x = jnp.pad(x, ((0, n_pad - n), (0, 0)))
    # MXU operands: bf16 by default (full-rate MXU + half the column-stream HBM bytes).
    x_mm = x.astype(matmul_dtype)
    # Squared norms from the (possibly rounded) MXU operand for self-consistency, in f32.
    xf = x_mm.astype(jnp.float32)
    sq = jnp.sum(xf * xf, axis=1)

    valid = jnp.arange(n_pad) < n
    sq_row = sq.reshape(n_pad, 1)
    # Pre-halved column norms (removes the x2 and the row-norm add from the O(N^2) path).
    # Padded columns get a BIG value so they never win the hardest-negative min.
    # Stored resident as (num_j, tile): row j == column tile j.
    half_sq_col = jnp.where(valid, 0.5 * sq, _BIG).reshape(num_j, tile).astype(jnp.float32)

    t = jnp.pad(targets.astype(jnp.int32), (0, n_pad - n), constant_values=_PAD_LABEL)
    t_row = t.reshape(n_pad, 1)
    t_col = t.reshape(num_j, tile)
    row_valid = valid.astype(jnp.float32).reshape(n_pad, 1)

    # x column stream: optionally triple-buffered (small D => short per-tile compute).
    col_idx = lambda i, j: (j, 0)
    x_col_spec = pl.BlockSpec((tile, d_pad), col_idx)
    if col_bufs > 2 and num_j >= col_bufs and hasattr(pl, "Buffered"):
        try:
            x_col_spec = pl.BlockSpec((tile, d_pad), col_idx,
                                      pipeline_mode=pl.Buffered(col_bufs))
        except Exception:
            x_col_spec = pl.BlockSpec((tile, d_pad), col_idx)

    grid_spec = pltpu.PrefetchScalarGridSpec(
        num_scalar_prefetch=0,
        grid=(num_i, num_j),
        in_specs=[
            pl.BlockSpec((tile, d_pad), lambda i, j: (i, 0)),     # x row block
            x_col_spec,                                           # x column block
            pl.BlockSpec((tile, 1), lambda i, j: (i, 0)),         # squared norms (rows)
            pl.BlockSpec((num_j, tile), lambda i, j: (0, 0)),     # 0.5*norms (cols), resident
            pl.BlockSpec((tile, 1), lambda i, j: (i, 0)),         # labels (rows)
            pl.BlockSpec((num_j, tile), lambda i, j: (0, 0)),     # labels (cols), resident
            pl.BlockSpec((tile, 1), lambda i, j: (i, 0)),         # row validity
        ],
        out_specs=pl.BlockSpec((tile, 1), lambda i, j: (i, 0)),
        scratch_shapes=[pltpu.VMEM((tile, 128), jnp.float32),     # lane-dense running max of h
                        pltpu.VMEM((tile, 128), jnp.float32)],    # lane-dense running min of h
    )

    cost = pl.CostEstimate(
        flops=2 * n_pad * n_pad * d_pad,
        transcendentals=2 * n_pad,
        bytes_accessed=(num_i + 1) * n_pad * d_pad * mm_itemsize + 24 * n_pad,
    )

    row_losses = pl.pallas_call(
        _make_triplet_kernel(margin, tile),
        out_shape=jax.ShapeDtypeStruct((n_pad, 1), jnp.float32),
        grid_spec=grid_spec,
        compiler_params=pltpu.CompilerParams(
            # "parallel" on the row-tile axis shards it across TensorCores on v7x;
            # both cores then stream the full x column set -- fine at 3.2 TB/s HBM,
            # and the first thing to revisit if v7x ever looks HBM-bound.
            dimension_semantics=("parallel", "arbitrary"),
            vmem_limit_bytes=vmem_limit,
        ),
        cost_estimate=cost,
    )(x_mm, x_mm, sq_row, half_sq_col, t_row, t_col, row_valid)

    # Padded rows contribute exactly 0; divide by the true batch size (mean).
    return jnp.sum(row_losses) / jnp.float32(n)


def _reference(inputs, targets, margin=1.0):
    x = np.asarray(inputs, dtype=np.float32)
    t = np.asarray(targets)
    n = x.shape[0]
    sq = (x ** 2).sum(axis=1, keepdims=True)
    dist = np.sqrt(np.maximum(sq + sq.T - 2.0 * (x @ x.T), 1e-12))
    mask = t[:, None] == t[None, :]
    ap = np.array([dist[i][mask[i]].max() for i in range(n)])
    an = np.array([dist[i][~mask[i]].min() for i in range(n)])
    return np.maximum(ap - an + margin, 0.0).mean()


if __name__ == "__main__":
    key = jax.random.PRNGKey(0)
    kx, ky = jax.random.split(key)

    # Small case (single tile after padding), matching the module's toy shapes.
    n, d = 8, 32
    inputs = jax.random.normal(kx, (n, d), dtype=jnp.float32)
    targets = jnp.array([0, 0, 0, 0, 1, 1, 1, 1], dtype=jnp.int32)
    ref = _reference(np.asarray(inputs), np.asarray(targets), margin=1.0)

    # Exact path (f32 MXU operands): tight tolerance.
    loss_f32 = jax.block_until_ready(
        triplet_loss(inputs, targets, margin=1.0, matmul_dtype=jnp.float32))
    assert np.allclose(np.asarray(loss_f32), ref, rtol=1e-4, atol=1e-4), (loss_f32, ref)

    # Default fast path (bf16 MXU operands, f32 accumulation): bf16-level tolerance.
    loss_bf16 = jax.block_until_ready(triplet_loss(inputs, targets, margin=1.0))
    assert np.allclose(np.asarray(loss_bf16), ref, rtol=1e-2, atol=1e-2), (loss_bf16, ref)

    # Larger case exercising the (2, 2) grid, the running accumulators, the resident
    # column-vector slicing (j > 0) and the N-/D-padding paths.
    n2, d2 = 200, 48
    inputs2 = jax.random.normal(ky, (n2, d2), dtype=jnp.float32)
    targets2 = (jnp.arange(n2) % 4).astype(jnp.int32)
    ref2 = _reference(np.asarray(inputs2), np.asarray(targets2), margin=1.0)

    loss2_f32 = jax.block_until_ready(
        triplet_loss(inputs2, targets2, margin=1.0, block=128, matmul_dtype=jnp.float32))
    assert np.allclose(np.asarray(loss2_f32), ref2, rtol=5e-4, atol=5e-4), (loss2_f32, ref2)

    loss2_bf16 = jax.block_until_ready(
        triplet_loss(inputs2, targets2, margin=1.0, block=128))
    assert np.allclose(np.asarray(loss2_bf16), ref2, rtol=1e-2, atol=1e-2), (loss2_bf16, ref2)

    # Auto (generation-aware) tile selection path.
    loss2_auto = jax.block_until_ready(triplet_loss(inputs2, targets2, margin=1.0))
    assert np.allclose(np.asarray(loss2_auto), ref2, rtol=1e-2, atol=1e-2), (loss2_auto, ref2)

    print("KERNEL_OK")
</pallas_src>

<mosaic_0001>
module attributes {stable_mosaic.version = 11 : i64} {
  func.func @kernel(%arg0: i32, %arg1: i32, %arg2: memref<128x128xf32, #tpu.memory_space<vmem>>, %arg3: memref<128x128xf32, #tpu.memory_space<vmem>>, %arg4: memref<128x1xf32, #tpu.memory_space<vmem>>, %arg5: memref<1x128xf32, #tpu.memory_space<vmem>>, %arg6: memref<128x1xi32, #tpu.memory_space<vmem>>, %arg7: memref<1x128xi32, #tpu.memory_space<vmem>>, %arg8: memref<128x1xf32, #tpu.memory_space<vmem>>, %arg9: memref<128x1xf32, #tpu.memory_space<vmem>>, %arg10: memref<128x128xf32, #tpu.memory_space<vmem>>, %arg11: memref<128x128xf32, #tpu.memory_space<vmem>>) attributes {dimension_semantics = [#tpu.dimension_semantics<parallel>, #tpu.dimension_semantics<arbitrary>], iteration_bounds = array<i64: 1, 1>, scalar_prefetch = 0 : i64, scratch_operands = 2 : i64, tpu.core_type = #tpu.core_type<tc>, window_params = [{transform_indices = @transform_0, window_bounds = array<i64: 128, 128>}, {transform_indices = @transform_1, window_bounds = array<i64: 128, 128>}, {transform_indices = @transform_2, window_bounds = array<i64: 128, 1>}, {pipeline_mode = #tpu.pipeline_mode<synchronous>, transform_indices = @transform_3, window_bounds = array<i64: 1, 128>}, {transform_indices = @transform_4, window_bounds = array<i64: 128, 1>}, {pipeline_mode = #tpu.pipeline_mode<synchronous>, transform_indices = @transform_5, window_bounds = array<i64: 1, 128>}, {transform_indices = @transform_6, window_bounds = array<i64: 128, 1>}, {transform_indices = @transform_7, window_bounds = array<i64: 128, 1>}]} {
    %c0_i32 = arith.constant 0 : i32
    %0 = arith.cmpi eq, %arg1, %c0_i32 : i32
    %1 = arith.extui %0 : i1 to i32
    %c0_i32_0 = arith.constant 0 : i32
    %2 = arith.cmpi ne, %1, %c0_i32_0 : i32
    scf.if %2 {
      %cst_20 = arith.constant -1.000000e+30 : f32
      %29 = vector.broadcast %cst_20 : f32 to vector<128x128xf32>
      %c0_21 = arith.constant 0 : index
      %c0_22 = arith.constant 0 : index
      %30 = vector.load %arg10[%c0_21, %c0_22] : memref<128x128xf32, #tpu.memory_space<vmem>>, vector<128x128xf32>
      tpu.vector_store %arg10[%c0_21, %c0_22], %29 {strides = array<i32>} : memref<128x128xf32, #tpu.memory_space<vmem>>, vector<128x128xf32>,
      %cst_23 = arith.constant 1.000000e+30 : f32
      %31 = vector.broadcast %cst_23 : f32 to vector<128x128xf32>
      %c0_24 = arith.constant 0 : index
      %c0_25 = arith.constant 0 : index
      %32 = vector.load %arg11[%c0_24, %c0_25] : memref<128x128xf32, #tpu.memory_space<vmem>>, vector<128x128xf32>
      tpu.vector_store %arg11[%c0_24, %c0_25], %31 {strides = array<i32>} : memref<128x128xf32, #tpu.memory_space<vmem>>, vector<128x128xf32>,
    } else {
    }
    %c0 = arith.constant 0 : index
    %c0_1 = arith.constant 0 : index
    %3 = vector.load %arg2[%c0, %c0_1] : memref<128x128xf32, #tpu.memory_space<vmem>>, vector<128x128xf32>
    %c0_2 = arith.constant 0 : index
    %c0_3 = arith.constant 0 : index
    %4 = vector.load %arg3[%c0_2, %c0_3] : memref<128x128xf32, #tpu.memory_space<vmem>>, vector<128x128xf32>
    %cst = arith.constant dense<0.000000e+00> : vector<128x128xf32>
    %5 = tpu.matmul %3, %4, %cst {dimension_numbers = #tpu.dot_dimension_numbers<[1], [1], [0], [0], [0, 0, 1, 0], [], []>} : vector<128x128xf32>, vector<128x128xf32>, vector<128x128xf32> -> vector<128x128xf32>
    %6 = arith.index_cast %arg1 : i32 to index
    %c0_4 = arith.constant 0 : index
    %7 = vector.load %arg5[%6, %c0_4] : memref<1x128xf32, #tpu.memory_space<vmem>>, vector<1x128xf32>
    %8 = arith.index_cast %arg1 : i32 to index
    %c0_5 = arith.constant 0 : index
    %9 = vector.load %arg7[%8, %c0_5] : memref<1x128xi32, #tpu.memory_space<vmem>>, vector<1x128xi32>
    %10 = vector.broadcast %7 : vector<1x128xf32> to vector<128x128xf32>
    %11 = arith.subf %10, %5 : vector<128x128xf32>
    %c0_6 = arith.constant 0 : index
    %c0_7 = arith.constant 0 : index
    %12 = vector.load %arg6[%c0_6, %c0_7] : memref<128x1xi32, #tpu.memory_space<vmem>>, vector<128x1xi32>
    %13 = vector.broadcast %12 : vector<128x1xi32> to vector<128x128xi32>
    %14 = vector.broadcast %9 : vector<1x128xi32> to vector<128x128xi32>
    %15 = arith.cmpi eq, %13, %14 : vector<128x128xi32>
    %cst_8 = arith.constant -1.000000e+30 : f32
    %16 = vector.broadcast %cst_8 : f32 to vector<128x128xf32>
    %17 = arith.select %15, %11, %16 : vector<128x128xi1>, vector<128x128xf32>
    %cst_9 = arith.constant 1.000000e+30 : f32
    %18 = vector.broadcast %cst_9 : f32 to vector<128x128xf32>
    %19 = arith.select %15, %18, %11 : vector<128x128xi1>, vector<128x128xf32>
    %c0_10 = arith.constant 0 : index
    %c0_11 = arith.constant 0 : index
    %20 = vector.load %arg10[%c0_10, %c0_11] : memref<128x128xf32, #tpu.memory_space<vmem>>, vector<128x128xf32>
    %c0_12 = arith.constant 0 : index
    %c0_13 = arith.constant 0 : index
    %21 = vector.load %arg11[%c0_12, %c0_13] : memref<128x128xf32, #tpu.memory_space<vmem>>, vector<128x128xf32>
    %22 = arith.maximumf %20, %17 : vector<128x128xf32>
    %23 = arith.minimumf %21, %19 : vector<128x128xf32>
    %c0_14 = arith.constant 0 : index
    %c0_15 = arith.constant 0 : index
    %24 = vector.load %arg10[%c0_14, %c0_15] : memref<128x128xf32, #tpu.memory_space<vmem>>, vector<128x128xf32>
    tpu.vector_store %arg10[%c0_14, %c0_15], %22 {strides = array<i32>} : memref<128x128xf32, #tpu.memory_space<vmem>>, vector<128x128xf32>,
    %c0_16 = arith.constant 0 : index
    %c0_17 = arith.constant 0 : index
    %25 = vector.load %arg11[%c0_16, %c0_17] : memref<128x128xf32, #tpu.memory_space<vmem>>, vector<128x128xf32>
    tpu.vector_store %arg11[%c0_16, %c0_17], %23 {strides = array<i32>} : memref<128x128xf32, #tpu.memory_space<vmem>>, vector<128x128xf32>,
    %c0_i32_18 = arith.constant 0 : i32
    %26 = arith.cmpi eq, %arg1, %c0_i32_18 : i32
    %27 = arith.extui %26 : i1 to i32
    %c0_i32_19 = arith.constant 0 : i32
    %28 = arith.cmpi ne, %27, %c0_i32_19 : i32
    scf.if %28 {
      %c0_20 = arith.constant 0 : index
      %c0_21 = arith.constant 0 : index
      %29 = vector.load %arg10[%c0_20, %c0_21] : memref<128x128xf32, #tpu.memory_space<vmem>>, vector<128x128xf32>
      %cst_22 = arith.constant dense<0xFF800000> : vector<128xf32>
      %30 = vector.multi_reduction <maximumf>, %29, %cst_22 [1] : vector<128x128xf32> to vector<128xf32>
      %31 = vector.shape_cast %30 : vector<128xf32> to vector<128x1xf32>
      %c0_23 = arith.constant 0 : index
      %c0_24 = arith.constant 0 : index
      %32 = vector.load %arg11[%c0_23, %c0_24] : memref<128x128xf32, #tpu.memory_space<vmem>>, vector<128x128xf32>
      %cst_25 = arith.constant dense<0x7F800000> : vector<128xf32>
      %33 = vector.multi_reduction <minimumf>, %32, %cst_25 [1] : vector<128x128xf32> to vector<128xf32>
      %34 = vector.shape_cast %33 : vector<128xf32> to vector<128x1xf32>
      %c0_26 = arith.constant 0 : index
      %c0_27 = arith.constant 0 : index
      %35 = vector.load %arg4[%c0_26, %c0_27] : memref<128x1xf32, #tpu.memory_space<vmem>>, vector<128x1xf32>
      %cst_28 = arith.constant 2.000000e+00 : f32
      %36 = vector.broadcast %cst_28 : f32 to vector<128x1xf32>
      %37 = arith.mulf %36, %31 : vector<128x1xf32>
      %38 = arith.addf %35, %37 : vector<128x1xf32>
      %cst_29 = arith.constant 9.99999996E-13 : f32
      %39 = vector.broadcast %cst_29 : f32 to vector<128x1xf32>
      %40 = arith.maximumf %38, %39 : vector<128x1xf32>
      %41 = math.sqrt %40 : vector<128x1xf32>
      %cst_30 = arith.constant 2.000000e+00 : f32
      %42 = vector.broadcast %cst_30 : f32 to vector<128x1xf32>
      %43 = arith.mulf %42, %34 : vector<128x1xf32>
      %44 = arith.addf %35, %43 : vector<128x1xf32>
      %cst_31 = arith.constant 9.99999996E-13 : f32
      %45 = vector.broadcast %cst_31 : f32 to vector<128x1xf32>
      %46 = arith.maximumf %44, %45 : vector<128x1xf32>
      %47 = math.sqrt %46 : vector<128x1xf32>
      %48 = arith.subf %41, %47 : vector<128x1xf32>
      %cst_32 = arith.constant 1.000000e+00 : f32
      %49 = vector.broadcast %cst_32 : f32 to vector<128x1xf32>
      %50 = arith.addf %48, %49 : vector<128x1xf32>
      %cst_33 = arith.constant 0.000000e+00 : f32
      %51 = vector.broadcast %cst_33 : f32 to vector<128x1xf32>
      %52 = arith.maximumf %50, %51 : vector<128x1xf32>
      %c0_34 = arith.constant 0 : index
      %c0_35 = arith.constant 0 : index
      %53 = vector.load %arg8[%c0_34, %c0_35] : memref<128x1xf32, #tpu.memory_space<vmem>>, vector<128x1xf32>
      %54 = arith.mulf %52, %53 : vector<128x1xf32>
      %c0_36 = arith.constant 0 : index
      %c0_37 = arith.constant 0 : index
      %55 = vector.load %arg9[%c0_36, %c0_37] : memref<128x1xf32, #tpu.memory_space<vmem>>, vector<128x1xf32>
      tpu.vector_store %arg9[%c0_36, %c0_37], %54 {strides = array<i32>} : memref<128x1xf32, #tpu.memory_space<vmem>>, vector<128x1xf32>,
    } else {
    }
    return
  }
  func.func @transform_0(%arg0: i32, %arg1: i32) -> (i32, i32) {
    %c0_i32 = arith.constant 0 : i32
    %c0_i32_0 = arith.constant 0 : i32
    return %arg0, %c0_i32 : i32, i32
  }
  func.func @transform_1(%arg0: i32, %arg1: i32) -> (i32, i32) {
    %c0_i32 = arith.constant 0 : i32
    %c0_i32_0 = arith.constant 0 : i32
    return %arg1, %c0_i32 : i32, i32
  }
  func.func @transform_2(%arg0: i32, %arg1: i32) -> (i32, i32) {
    %c0_i32 = arith.constant 0 : i32
    %c0_i32_0 = arith.constant 0 : i32
    return %arg0, %c0_i32 : i32, i32
  }
  func.func @transform_3(%arg0: i32, %arg1: i32) -> (i32, i32) {
    %c0_i32 = arith.constant 0 : i32
    %c0_i32_0 = arith.constant 0 : i32
    %c0_i32_1 = arith.constant 0 : i32
    return %c0_i32, %c0_i32_0 : i32, i32
  }
  func.func @transform_4(%arg0: i32, %arg1: i32) -> (i32, i32) {
    %c0_i32 = arith.constant 0 : i32
    %c0_i32_0 = arith.constant 0 : i32
    return %arg0, %c0_i32 : i32, i32
  }
  func.func @transform_5(%arg0: i32, %arg1: i32) -> (i32, i32) {
    %c0_i32 = arith.constant 0 : i32
    %c0_i32_0 = arith.constant 0 : i32
    %c0_i32_1 = arith.constant 0 : i32
    return %c0_i32, %c0_i32_0 : i32, i32
  }
  func.func @transform_6(%arg0: i32, %arg1: i32) -> (i32, i32) {
    %c0_i32 = arith.constant 0 : i32
    %c0_i32_0 = arith.constant 0 : i32
    return %arg0, %c0_i32 : i32, i32
  }
  func.func @transform_7(%arg0: i32, %arg1: i32) -> (i32, i32) {
    %c0_i32 = arith.constant 0 : i32
    %c0_i32_0 = arith.constant 0 : i32
    return %arg0, %c0_i32 : i32, i32
  }
}

</mosaic_0001>

<bundles_post_ra>
// kernel: tpu_custom_call.1
= control target key start
LH: loop header
LB: loop body
LE: loop exit
PB: predicated region body
PF: predicated region fallthrough
CT: control target
= control target key end

     0   :  { %v1203_v1 = vmov 0   ;;  %s2109_s1 = inlined_call_operand.vmem [shape: f32[128,128], index: 1, kind: input, shape index: {}]   ;;  %s2110_s4 = inlined_call_operand.vmem [shape: s32[128,1], index: 4, kind: input, shape index: {}]   ;;  %s2111_s5 = inlined_call_operand.vmem [shape: s32[1,128], index: 5, kind: input, shape index: {}]   ;;  %s2112_s3 = inlined_call_operand.vmem [shape: f32[1,128], index: 3, kind: input, shape index: {}]   ;;  %s2113_s0 = inlined_call_operand.vmem [shape: f32[128,128], index: 0, kind: input, shape index: {}]   ;;  %s2114_s2 = inlined_call_operand.vmem [shape: f32[128,1], index: 2, kind: input, shape index: {}]   ;;  %s2115_s6 = inlined_call_operand.vmem [shape: f32[128,1], index: 6, kind: input, shape index: {}]   ;;  %s2116_s7 = inlined_call_operand.vmem [shape: f32[128,1], index: 7, kind: output, shape index: {}]  }
   0x1   :  { %v93_v0 = vld [vmem:[%s2109_s1 + $0x78] sm:$0xff]  ;;  %1134 = vset.pattern.permute.xlu0 %v1203_v1  ;;  %1135 = vset.pattern.permute.xlu1 %v1203_v1  ;;  %v180_v2 = vld [vmem:[%s2110_s4] sm:$0xff]  ;;  %v92_v3 = vld [vmem:[%s2109_s1 + $0x70] sm:$0xff] }
   0x2   :  { %94 = vmatpush.xpose.msra.mxu0 %v93_v0  ;;  %1085 = vmatpush.xpose.msra.mxu1 %v93_v0  ;;  %v91_v4 = vld [vmem:[%s2109_s1 + $0x68] sm:$0xff]  ;;  %v90_v6 = vld [vmem:[%s2109_s1 + $0x60] sm:$0xff]  ;;  %v182_v7 = vld [vmem:[%s2110_s4 + $0x10] sm:$0xff] }
   0x3   :  { %1086 = vmatpush.xpose.msra.mxu2 %v93_v0  ;;  %1087 = vmatpush.xpose.msra.mxu3 %v93_v0  ;;  %v181_v5 = vld [vmem:[%s2110_s4 + $0x8] sm:$0xff]  ;;  %v89_v8 = vld [vmem:[%s2109_s1 + $0x58] sm:$0xff]  ;;  %v186_v9 = vld [vmem:[%s2110_s4 + $0x30] sm:$0xff] }
   0x4   :  { %197 = vperm.xlu0 %1134, %v180_v2   ;;  %1136 = vset.pattern.permute.xlu2 %v1203_v1  ;;  %v88_v10 = vld [vmem:[%s2109_s1 + $0x50] sm:$0xff]  ;;  %v183_v11 = vld [vmem:[%s2110_s4 + $0x18] sm:$0xff]  ;;  %v87_v12 = vld [vmem:[%s2109_s1 + $0x48] sm:$0xff] }
   0x5   :  { %203 = vperm.xlu1 %1135, %v182_v7   ;;  %v189_v13 = vld [vmem:[%s2110_s4 + $0x48] sm:$0xff]  ;;  %v86_v14 = vld [vmem:[%s2109_s1 + $0x40] sm:$0xff]  ;;  %v187_v16 = vld [vmem:[%s2110_s4 + $0x38] sm:$0xff] }
   0x6   :  { %95 = vmatpush.xpose.msra.mxu0 %v92_v3  ;;  %1088 = vmatpush.xpose.msra.mxu1 %v92_v3  ;;  %v184_v15 = vld [vmem:[%s2110_s4 + $0x20] sm:$0xff]  ;;  %v85_v17 = vld [vmem:[%s2109_s1 + $0x38] sm:$0xff]  ;;  %v185_v19 = vld [vmem:[%s2110_s4 + $0x28] sm:$0xff] }
   0x7   :  { %1089 = vmatpush.xpose.msra.mxu2 %v92_v3  ;;  %1090 = vmatpush.xpose.msra.mxu3 %v92_v3  ;;  %v192_v18 = vld [vmem:[%s2110_s4 + $0x60] sm:$0xff]  ;;  %v190_v20 = vld [vmem:[%s2110_s4 + $0x50] sm:$0xff]  ;;  %v83_v22 = vld [vmem:[%s2109_s1 + $0x28] sm:$0xff] }
   0x8   :  { %209 = vperm.xlu2 %1136, %v184_v15   ;;  %v84_v21 = vld [vmem:[%s2109_s1 + $0x30] sm:$0xff]  ;;  %v195_v23 = vld [vmem:[%s2110_s4 + $0x78] sm:$0xff]  ;;  %v188_v24 = vld [vmem:[%s2110_s4 + $0x40] sm:$0xff] }
   0x9   :  { %v193_v25 = vld [vmem:[%s2110_s4 + $0x68] sm:$0xff]  ;;  %v82_v26 = vld [vmem:[%s2109_s1 + $0x20] sm:$0xff]  ;;  %v81_v27 = vld [vmem:[%s2109_s1 + $0x18] sm:$0xff] }
   0xa   :  { %96 = vmatpush.xpose.msra.mxu0 %v91_v4  ;;  %1091 = vmatpush.xpose.msra.mxu1 %v91_v4  ;;  %v191_v28 = vld [vmem:[%s2110_s4 + $0x58] sm:$0xff]  ;;  %v80_v29 = vld [vmem:[%s2109_s1 + $0x10] sm:$0xff]  ;;  %v79_v30 = vld [vmem:[%s2109_s1 + $0x8] sm:$0xff] }
   0xb   :  { %1092 = vmatpush.xpose.msra.mxu2 %v91_v4  ;;  %1093 = vmatpush.xpose.msra.mxu3 %v91_v4  ;;  %v194_v31 = vld [vmem:[%s2110_s4 + $0x70] sm:$0xff]  ;;  %v78_v32 = vld [vmem:[%s2109_s1] sm:$0xff]  ;;  %v63_v37 = vld [vmem:[%s2113_s0 + $0x8] sm:$0xff] }
   0xc   :  { %200 = vperm.xlu0 %1134, %v181_v5   ;;  %v62_v33 = vld [vmem:[%s2113_s0] sm:$0xff]  ;;  %v67_v38 = vld [vmem:[%s2113_s0 + $0x28] sm:$0xff]  ;;  %v64_v41 = vld [vmem:[%s2113_s0 + $0x10] sm:$0xff] }
   0xd   :  { %206 = vperm.xlu1 %1135, %v183_v11   ;;  %v66_v34 = vld [vmem:[%s2113_s0 + $0x20] sm:$0xff]  ;;  %v71_v39 = vld [vmem:[%s2113_s0 + $0x48] sm:$0xff]  ;;  %v68_v42 = vld [vmem:[%s2113_s0 + $0x30] sm:$0xff] }
   0xe   :  { %97 = vmatpush.xpose.msra.mxu0 %v90_v6  ;;  %1094 = vmatpush.xpose.msra.mxu1 %v90_v6  ;;  %v70_v35 = vld [vmem:[%s2113_s0 + $0x40] sm:$0xff]  ;;  %v75_v40 = vld [vmem:[%s2113_s0 + $0x68] sm:$0xff]  ;;  %v72_v43 = vld [vmem:[%s2113_s0 + $0x50] sm:$0xff] }
   0xf   :  { %1095 = vmatpush.xpose.msra.mxu2 %v90_v6  ;;  %1096 = vmatpush.xpose.msra.mxu3 %v90_v6  ;;  %v74_v36 = vld [vmem:[%s2113_s0 + $0x60] sm:$0xff]  ;;  %v76_v44 = vld [vmem:[%s2113_s0 + $0x70] sm:$0xff]  ;;  %v65_v45 = vld [vmem:[%s2113_s0 + $0x18] sm:$0xff] }
  0x10   :  { %212 = vperm.xlu2 %1136, %v185_v19   ;;  %v69_v46 = vld [vmem:[%s2113_s0 + $0x38] sm:$0xff]  ;;  %v1397_v55 = vld [vmem:[%s2112_s3] ss:$0 sm:$0xff] }
  0x11   :  { %v73_v47 = vld [vmem:[%s2113_s0 + $0x58] sm:$0xff]  ;;  %v1402_v56 = vld [vmem:[%s2111_s5] ss:$0 sm:$0xff] }
  0x12   :  { %98 = vmatpush.xpose.msra.mxu0 %v89_v8  ;;  %1097 = vmatpush.xpose.msra.mxu1 %v89_v8  ;;  %v77_v48 = vld [vmem:[%s2113_s0 + $0x78] sm:$0xff] }
  0x13   :  { %1098 = vmatpush.xpose.msra.mxu2 %v89_v8  ;;  %1099 = vmatpush.xpose.msra.mxu3 %v89_v8 }
  0x14   :  { %215 = vperm.xlu0 %1134, %v186_v9  }
  0x15   :  { %218 = vperm.xlu1 %1135, %v187_v16  }
  0x16   :  { %99 = vmatpush.xpose.msra.mxu0 %v88_v10  ;;  %1100 = vmatpush.xpose.msra.mxu1 %v88_v10 }
  0x17   :  { %1101 = vmatpush.xpose.msra.mxu2 %v88_v10  ;;  %1102 = vmatpush.xpose.msra.mxu3 %v88_v10 }
  0x18   :  { %221 = vperm.xlu2 %1136, %v188_v24  }
  0x1a   :  { %100 = vmatpush.xpose.msra.mxu0 %v87_v12  ;;  %1103 = vmatpush.xpose.msra.mxu1 %v87_v12 }
  0x1b   :  { %1104 = vmatpush.xpose.msra.mxu2 %v87_v12  ;;  %1105 = vmatpush.xpose.msra.mxu3 %v87_v12 }
  0x1c   :  { %224 = vperm.xlu0 %1134, %v189_v13  }
  0x1d   :  { %227 = vperm.xlu1 %1135, %v190_v20  }
  0x1e   :  { %101 = vmatpush.xpose.msra.mxu0 %v86_v14  ;;  %1106 = vmatpush.xpose.msra.mxu1 %v86_v14 }
  0x1f   :  { %1107 = vmatpush.xpose.msra.mxu2 %v86_v14  ;;  %1108 = vmatpush.xpose.msra.mxu3 %v86_v14 }
  0x20   :  { %230 = vperm.xlu2 %1136, %v191_v28  }
  0x22   :  { %102 = vmatpush.xpose.msra.mxu0 %v85_v17  ;;  %1109 = vmatpush.xpose.msra.mxu1 %v85_v17 }
  0x23   :  { %1110 = vmatpush.xpose.msra.mxu2 %v85_v17  ;;  %1111 = vmatpush.xpose.msra.mxu3 %v85_v17 }
  0x24   :  { %233 = vperm.xlu0 %1134, %v192_v18  }
  0x25   :  { %236 = vperm.xlu1 %1135, %v193_v25  }
  0x26   :  { %103 = vmatpush.xpose.msra.mxu0 %v84_v21  ;;  %1112 = vmatpush.xpose.msra.mxu1 %v84_v21 }
  0x27   :  { %1113 = vmatpush.xpose.msra.mxu2 %v84_v21  ;;  %1114 = vmatpush.xpose.msra.mxu3 %v84_v21 }
  0x28   :  { %239 = vperm.xlu2 %1136, %v194_v31  }
  0x2a   :  { %104 = vmatpush.xpose.msra.mxu0 %v83_v22  ;;  %1115 = vmatpush.xpose.msra.mxu1 %v83_v22 }
  0x2b   :  { %1116 = vmatpush.xpose.msra.mxu2 %v83_v22  ;;  %1117 = vmatpush.xpose.msra.mxu3 %v83_v22 }
  0x2c   :  { %242 = vperm.xlu0 %1134, %v195_v23  }
  0x2e   :  { %105 = vmatpush.xpose.msra.mxu0 %v82_v26  ;;  %1118 = vmatpush.xpose.msra.mxu1 %v82_v26 }
  0x2f   :  { %1119 = vmatpush.xpose.msra.mxu2 %v82_v26  ;;  %1120 = vmatpush.xpose.msra.mxu3 %v82_v26 }
  0x32   :  { %106 = vmatpush.xpose.msra.mxu0 %v81_v27  ;;  %1121 = vmatpush.xpose.msra.mxu1 %v81_v27 }
  0x33   :  { %1122 = vmatpush.xpose.msra.mxu2 %v81_v27  ;;  %1123 = vmatpush.xpose.msra.mxu3 %v81_v27 }
  0x36   :  { %107 = vmatpush.xpose.msra.mxu0 %v80_v29  ;;  %1124 = vmatpush.xpose.msra.mxu1 %v80_v29 }
  0x37   :  { %1125 = vmatpush.xpose.msra.mxu2 %v80_v29  ;;  %1126 = vmatpush.xpose.msra.mxu3 %v80_v29 }
  0x3a   :  { %108 = vmatpush.xpose.msra.mxu0 %v79_v30  ;;  %1127 = vmatpush.xpose.msra.mxu1 %v79_v30 }
  0x3b   :  { %1128 = vmatpush.xpose.msra.mxu2 %v79_v30  ;;  %1129 = vmatpush.xpose.msra.mxu3 %v79_v30 }
  0x3e   :  { %109 = vmatpush.xpose.msra.mxu0 %v78_v32  ;;  %1130 = vmatpush.xpose.msra.mxu1 %v78_v32 }
  0x3f   :  { %1131 = vmatpush.xpose.msra.mxu2 %v78_v32  ;;  %1132 = vmatpush.xpose.msra.mxu3 %v78_v32 }
  0x41   :  { %110 = vmatmul.f32.vlgmr.msra.gmra.mxu0 %v62_v33  ;;  %122 = vmatmul.f32.vlgmr.msra.gmra.mxu1 %v66_v34 }
  0x42   :  { %134 = vmatmul.f32.vlgmr.msra.gmra.mxu2 %v70_v35  ;;  %146 = vmatmul.f32.vlgmr.msra.gmra.mxu3 %v74_v36 }
  0x49   :  { %113 = vmatmul.f32.gmra.mxu0 %v63_v37  ;;  %125 = vmatmul.f32.gmra.mxu1 %v67_v38 }
  0x4a   :  { %137 = vmatmul.f32.gmra.mxu2 %v71_v39  ;;  %149 = vmatmul.f32.gmra.mxu3 %v75_v40 }
  0x51   :  { %116 = vmatmul.f32.gmra.mxu0 %v64_v41  ;;  %128 = vmatmul.f32.gmra.mxu1 %v68_v42 }
  0x52   :  { %140 = vmatmul.f32.gmra.mxu2 %v72_v43  ;;  %152 = vmatmul.f32.gmra.mxu3 %v76_v44 }
  0x59   :  { %119 = vmatmul.f32.gmra.mxu0 %v65_v45  ;;  %131 = vmatmul.f32.gmra.mxu1 %v69_v46 }
  0x5a   :  { %143 = vmatmul.f32.gmra.mxu2 %v73_v47  ;;  %155 = vmatmul.f32.gmra.mxu3 %v77_v48 }
  0x62   :  { %v210_v51 = vpop.permute.xlu2 %209 }
  0x63   :  { %vm249_vm1 = vcmp.eq.s32.totalorder %v210_v51, %v1402_v56 }
  0x6a   :  { %v213_v54 = vpop.permute.xlu2 %212 }
  0x6b   :  { %vm250_vm5 = vcmp.eq.s32.totalorder %v213_v54, %v1402_v56 }
  0x72   :  { %v222_v3 = vpop.permute.xlu2 %221 }
  0x73   :  { %vm253_vm3 = vcmp.eq.s32.totalorder %v222_v3, %v1402_v56 }
  0x76   :  { %v198_v49 = vpop.permute.xlu0 %197 }
  0x77   :  { %v1392_v53 = vpop.permute.xlu1 %203  ;;  %vm245_vm0 = vcmp.eq.s32.totalorder %v198_v49, %v1402_v56 }
  0x78   :  { %vm247_vm11 = vcmp.eq.s32.totalorder %v1392_v53, %v1402_v56 }
  0x7a   :  { %v231_v37 = vpop.permute.xlu2 %230 }
  0x7b   :  { %vm256_vm10 = vcmp.eq.s32.totalorder %v231_v37, %v1402_v56 }
  0x7e   :  { %v1388_v50 = vpop.permute.xlu0 %200 }
  0x7f   :  { %v1406_v58 = vpop.permute.xlu1 %206  ;;  %vm246_vm4 = vcmp.eq.s32.totalorder %v1388_v50, %v1402_v56 }
  0x80   :  { %vm248_vm15 = vcmp.eq.s32.totalorder %v1406_v58, %v1402_v56  ;;  %v492_v58 = vld [vmem:[%s2114_s2 + $0x20] sm:$0xff] }
  0x86   :  { %v1390_v52 = vpop.permute.xlu0 %215 }
  0x87   :  { %v219_v10 = vpop.permute.xlu1 %218  ;;  %vm251_vm13 = vcmp.eq.s32.totalorder %v1390_v52, %v1402_v56 }
  0x88   :  { %vm252_vm6 = vcmp.eq.s32.totalorder %v219_v10, %v1402_v56 }
  0x8e   :  { %v1404_v57 = vpop.permute.xlu0 %224 }
  0x8f   :  { %v1438_v25 = vpop.permute.xlu1 %227  ;;  %vm254_vm7 = vcmp.eq.s32.totalorder %v1404_v57, %v1402_v56 }
  0x90   :  { %vm255_vm14 = vcmp.eq.s32.totalorder %v1438_v25, %v1402_v56 }
  0x96   :  { %v234_v6 = vpop.permute.xlu0 %233 }
  0x97   :  { %vm257_vm2 = vcmp.eq.s32.totalorder %v234_v6, %v1402_v56  ;;  %v1451_v44 = vpop.permute.xlu1 %236  ;;  %v240_v6 = vpop.permute.xlu2 %239 }
  0x98   :  { %vm258_vm8 = vcmp.eq.s32.totalorder %v1451_v44, %v1402_v56  ;;  %vm259_vm12 = vcmp.eq.s32.totalorder %v240_v6, %v1402_v56 }
  0x9e   :  { %v243_v46 = vpop.permute.xlu0 %242 }
  0x9f   :  { %vm260_vm9 = vcmp.eq.s32.totalorder %v243_v46, %v1402_v56  ;;  %v496_v46 = vld [vmem:[%s2114_s2 + $0x40] sm:$0xff] }
  0xbe   :  { %v111_v59 = vpop.f32.mrf.mxu0  ;;  %v123_v60 = vpop.f32.mrf.mxu1 }
  0xbf   :  { %v164_v61 = vsub.f32 %v1397_v55, %v111_v59  ;;  %v168_v62 = vsub.f32 %v1397_v55, %v123_v60 }
  0xc1   :  { %v281_v63 = vsel %vm249_vm1, 1e+30, %v168_v62  ;;  %v261_v0 = vsel %vm245_vm0, %v164_v61, -1e+30  ;;  %v265_v11 = vsel %vm249_vm1, %v168_v62, -1e+30 }
  0xc2   :  { %v345_v1 = vmin.f32 %v281_v63, 1e+30  ;;  %v325_v2 = vmax.f32 %v261_v0, -1e+30  ;;  %v329_v17 = vmax.f32 %v265_v11, -1e+30 }
  0xc3   :  { %v277_v23 = vsel %vm245_vm0, 1e+30, %v164_v61 }
  0xc4   :  { %464 = vmin.xlane.f32.xlu2 %v345_v1  ;;  %408 = vmax.xlane.f32.xlu1 %v325_v2  ;;  %v341_v28 = vmin.f32 %v277_v23, 1e+30 }
  0xc5   :  { %v135_v4 = vpop.f32.mrf.mxu2  ;;  %v147_v5 = vpop.f32.mrf.mxu3 }
  0xc6   :  { %v172_v7 = vsub.f32 %v1397_v55, %v135_v4  ;;  %v176_v8 = vsub.f32 %v1397_v55, %v147_v5  ;;  %v126_v9 = vpop.f32.mrf.mxu1  ;;  %v114_v12 = vpop.f32.mrf.mxu0 }
  0xc7   :  { %v165_v18 = vsub.f32 %v1397_v55, %v114_v12  ;;  %v169_v27 = vsub.f32 %v1397_v55, %v126_v9 }
  0xc8   :  { %v273_v13 = vsel %vm257_vm2, %v176_v8, -1e+30  ;;  %v269_v14 = vsel %vm253_vm3, %v172_v7, -1e+30  ;;  %v285_v22 = vsel %vm253_vm3, 1e+30, %v172_v7 }
  0xc9   :  { %v337_v15 = vmax.f32 %v273_v13, -1e+30  ;;  %v333_v16 = vmax.f32 %v269_v14, -1e+30  ;;  %v262_v24 = vsel %vm246_vm4, %v165_v18, -1e+30 }
  0xca   :  { %v349_v26 = vmin.f32 %v285_v22, 1e+30  ;;  %v326_v29 = vmax.f32 %v262_v24, -1e+30  ;;  %v282_v33 = vsel %vm250_vm5, 1e+30, %v169_v27 }
  0xcb   :  { %432 = vmax.xlane.f32.xlu0 %v337_v15  ;;  %v289_v34 = vsel %vm257_vm2, 1e+30, %v176_v8  ;;  %v266_v36 = vsel %vm250_vm5, %v169_v27, -1e+30  ;;  %v346_v38 = vmin.f32 %v282_v33, 1e+30 }
  0xcc   :  { %424 = vmax.xlane.f32.xlu2 %v333_v16  ;;  %416 = vmax.xlane.f32.xlu1 %v329_v17  ;;  %v353_v39 = vmin.f32 %v289_v34, 1e+30  ;;  %v330_v41 = vmax.f32 %v266_v36, -1e+30  ;;  %v278_v61 = vsel %vm246_vm4, 1e+30, %v165_v18 }
  0xcd   :  { %v138_v19 = vpop.f32.mrf.mxu2  ;;  %v150_v20 = vpop.f32.mrf.mxu3  ;;  %v342_v4 = vmin.f32 %v278_v61, 1e+30 }
  0xce   :  { %v1429_v21 = vpop.f32.mrf.mxu1  ;;  %v173_v40 = vsub.f32 %v1397_v55, %v138_v19  ;;  %v1454_v45 = vsub.f32 %v1397_v55, %v150_v20  ;;  %v117_v59 = vpop.f32.mrf.mxu0 }
  0xcf   :  { %v166_v2 = vsub.f32 %v1397_v55, %v117_v59  ;;  %v170_v11 = vsub.f32 %v1397_v55, %v1429_v21 }
  0xd0   :  { %v270_v54 = vsel %vm254_vm7, %v173_v40, -1e+30  ;;  %v274_v60 = vsel %vm258_vm8, %v1454_v45, -1e+30  ;;  %v286_v8 = vsel %vm254_vm7, 1e+30, %v173_v40 }
  0xd1   :  { %v334_v1 = vmax.f32 %v270_v54, -1e+30  ;;  %v338_v3 = vmax.f32 %v274_v60, -1e+30  ;;  %v263_v50 = vsel %vm247_vm11, %v166_v2, -1e+30 }
  0xd2   :  { %v327_v10 = vmax.f32 %v263_v50, -1e+30  ;;  %v350_v12 = vmin.f32 %v286_v8, 1e+30  ;;  %v267_v57 = vsel %vm251_vm13, %v170_v11, -1e+30 }
  0xd3   :  { %472 = vmin.xlane.f32.xlu0 %v349_v26  ;;  %v283_v15 = vsel %vm251_vm13, 1e+30, %v170_v11  ;;  %v331_v18 = vmax.f32 %v267_v57, -1e+30  ;;  %v279_v52 = vsel %vm247_vm11, 1e+30, %v166_v2 }
  0xd4   :  { %456 = vmin.xlane.f32.xlu1 %v341_v28  ;;  %410 = vmax.xlane.f32.xlu2 %v326_v29  ;;  %v347_v19 = vmin.f32 %v283_v15, 1e+30  ;;  %v343_v24 = vmin.f32 %v279_v52, 1e+30  ;;  %v290_v33 = vsel %vm258_vm8, 1e+30, %v1454_v45 }
  0xd5   :  { %v141_v30 = vpop.f32.mrf.mxu2  ;;  %v153_v31 = vpop.f32.mrf.mxu3  ;;  %v354_v36 = vmin.f32 %v290_v33, 1e+30  ;;  %vm1064_vm7 = vcmask 7168  }
  0xd6   :  { %v132_v32 = vpop.f32.mrf.mxu1  ;;  %v178_v7 = vsub.f32 %v1397_v55, %v153_v31  ;;  %v174_v14 = vsub.f32 %v1397_v55, %v141_v30  ;;  %v120_v17 = vpop.f32.mrf.mxu0 }
  0xd7   :  { %v171_v35 = vsub.f32 %v1397_v55, %v132_v32  ;;  %v167_v21 = vsub.f32 %v1397_v55, %v120_v17 }
  0xd8   :  { %v275_v9 = vsel %vm259_vm12, %v178_v7, -1e+30  ;;  %v287_v16 = vsel %vm255_vm14, 1e+30, %v174_v14  ;;  %v271_v22 = vsel %vm255_vm14, %v174_v14, -1e+30 }
  0xd9   :  { %v1447_v42 = vsel %vm252_vm6, %v171_v35, -1e+30  ;;  %v1449_v43 = vsel %vm252_vm6, 1e+30, %v171_v35  ;;  %v339_v13 = vmax.f32 %v275_v9, -1e+30 }
  0xda   :  { %v351_v20 = vmin.f32 %v287_v16, 1e+30  ;;  %v264_v23 = vsel %vm248_vm15, %v167_v21, -1e+30  ;;  %v335_v25 = vmax.f32 %v271_v22, -1e+30 }
  0xdb   :  { %466 = vmin.xlane.f32.xlu0 %v346_v38  ;;  %v328_v26 = vmax.f32 %v264_v23, -1e+30  ;;  %v332_v27 = vmax.f32 %v1447_v42, -1e+30  ;;  %v348_v28 = vmin.f32 %v1449_v43, 1e+30 }
  0xdc   :  { %480 = vmin.xlane.f32.xlu1 %v353_v39  ;;  %418 = vmax.xlane.f32.xlu2 %v330_v41  ;;  %v280_v53 = vsel %vm248_vm15, 1e+30, %v167_v21  ;;  %v291_v32 = vsel %vm259_vm12, 1e+30, %v178_v7  ;;  %v488_v38 = vld [vmem:[%s2114_s2] sm:$0xff]  ;;  %v1555_v23 = vld [vmem:[%s2114_s2 + $0x8] sm:$0xff] }
  0xdd   :  { %v144_v47 = vpop.f32.mrf.mxu2  ;;  %v156_v48 = vpop.f32.mrf.mxu3  ;;  %v344_v30 = vmin.f32 %v280_v53, 1e+30  ;;  %v355_v34 = vmin.f32 %v291_v32, 1e+30 }
  0xde   :  { %v175_v49 = vsub.f32 %v1397_v55, %v144_v47  ;;  %v179_v51 = vsub.f32 %v1397_v55, %v156_v48 }
  0xe0   :  { %v276_v62 = vsel %vm260_vm9, %v179_v51, -1e+30  ;;  %v288_v63 = vsel %vm256_vm10, 1e+30, %v175_v49  ;;  %v272_v0 = vsel %vm256_vm10, %v175_v49, -1e+30 }
  0xe1   :  { %v292_v5 = vsel %vm260_vm9, 1e+30, %v179_v51  ;;  %v340_v55 = vmax.f32 %v276_v62, -1e+30  ;;  %v352_v29 = vmin.f32 %v288_v63, 1e+30 }
  0xe2   :  { %v336_v31 = vmax.f32 %v272_v0, -1e+30  ;;  %v356_v35 = vmin.f32 %v292_v5, 1e+30  ;;  %v1532_v49 = vld [vmem:[%s2114_s2 + $0x60] sm:$0xff] }
  0xe3   :  { %426 = vmax.xlane.f32.xlu0 %v334_v1 }
  0xe4   :  { %434 = vmax.xlane.f32.xlu1 %v338_v3  ;;  %458 = vmin.xlane.f32.xlu2 %v342_v4 }
  0xeb   :  { %412 = vmax.xlane.f32.xlu0 %v327_v10 }
  0xec   :  { %474 = vmin.xlane.f32.xlu1 %v350_v12  ;;  %436 = vmax.xlane.f32.xlu2 %v339_v13 }
  0xf3   :  { %420 = vmax.xlane.f32.xlu0 %v331_v18 }
  0xf4   :  { %468 = vmin.xlane.f32.xlu1 %v347_v19  ;;  %476 = vmin.xlane.f32.xlu2 %v351_v20 }
  0xfb   :  { %460 = vmin.xlane.f32.xlu0 %v343_v24 }
  0xfc   :  { %428 = vmax.xlane.f32.xlu1 %v335_v25  ;;  %414 = vmax.xlane.f32.xlu2 %v328_v26 }
 0x103   :  { %438 = vmax.xlane.f32.xlu0 %v340_v55 }
 0x104   :  { %422 = vmax.xlane.f32.xlu1 %v332_v27  ;;  %470 = vmin.xlane.f32.xlu2 %v348_v28 }
 0x10b   :  { %478 = vmin.xlane.f32.xlu0 %v352_v29 }
 0x10c   :  { %462 = vmin.xlane.f32.xlu1 %v344_v30  ;;  %430 = vmax.xlane.f32.xlu2 %v336_v31 }
 0x113   :  { %484 = vmin.xlane.f32.xlu0 %v355_v34 }
 0x114   :  { %486 = vmin.xlane.f32.xlu1 %v356_v35  ;;  %482 = vmin.xlane.f32.xlu2 %v354_v36 }
 0x137   :  { %v465_v37 = vpop.xlane.xlu2 %464  ;;  %v409_v39 = vpop.xlane.xlu1 %408 }
 0x138   :  { %v748_v40 = vmul.f32 2.0, %v465_v37  ;;  %v504_v41 = vmul.f32 2.0, %v409_v39  ;;  %v493_v37 = vld [vmem:[%s2114_s2 + $0x28] sm:$0xff] }
 0x13a   :  { %v764_v56 = vadd.f32 %v748_v40, %v492_v58  ;;  %v520_v42 = vadd.f32 %v504_v41, %v488_v38 }
 0x13c   :  { %v1520_v43 = vmax.f32 %v764_v56, 1e-12  ;;  %v1522_v44 = vmax.f32 %v520_v42, 1e-12 }
 0x13e   :  { %1139 = vrsqrt.f32 %v1520_v43  ;;  %v433_v45 = vpop.xlane.xlu0 %432  ;;  %vm847_vm0 = vcmp.eq.f32.partialorder %v1520_v43, inf  ;;  %vm849_vm1 = vcmp.eq.f32.partialorder %v1520_v43, 0.0  ;;  %v850_v34 = vand.u32 2147483648, %v1520_v43 }
 0x13f   :  { %1141 = vrsqrt.f32 %v1522_v44  ;;  %v425_v47 = vpop.xlane.xlu2 %424  ;;  %v417_v48 = vpop.xlane.xlu1 %416  ;;  %v516_v51 = vmul.f32 2.0, %v433_v45  ;;  %v562_v36 = vand.u32 2147483648, %v1522_v44  ;;  %vm559_vm4 = vcmp.eq.f32.partialorder %v1522_v44, inf }
 0x140   :  { %v512_v54 = vmul.f32 2.0, %v425_v47  ;;  %v508_v59 = vmul.f32 2.0, %v417_v48  ;;  %vm561_vm8 = vcmp.eq.f32.partialorder %v1522_v44, 0.0 }
 0x141   :  { %v532_v62 = vadd.f32 %v516_v51, %v1532_v49 }
 0x142   :  { %v528_v60 = vadd.f32 %v512_v54, %v496_v46  ;;  %v524_v61 = vadd.f32 %v508_v59, %v492_v58 }
 0x143   :  { %v1541_v7 = vmax.f32 %v532_v62, 1e-12 }
 0x144   :  { %v1140_v63 = vpop.eup %1139  ;;  %v1535_v0 = vmax.f32 %v528_v60, 1e-12  ;;  %v1537_v1 = vmax.f32 %v524_v61, 1e-12 }
 0x145   :  { %v1142_v2 = vpop.eup %1141  ;;  %v841_v3 = vmul.f32 %v1140_v63, %v1520_v43  ;;  %vm703_vm13 = vcmp.eq.f32.partialorder %v1541_v7, inf  ;;  %vm705_vm14 = vcmp.eq.f32.partialorder %v1541_v7, 0.0 }
 0x146   :  { %v553_v4 = vmul.f32 %v1142_v2, %v1522_v44  ;;  %v473_v5 = vpop.xlane.xlu0 %472  ;;  %1143 = vrsqrt.f32 %v1535_v0  ;;  %vm655_vm2 = vcmp.eq.f32.partialorder %v1535_v0, inf  ;;  %vm607_vm3 = vcmp.eq.f32.partialorder %v1537_v1, inf }
 0x147   :  { %v842_v6 = vmul.f32 %v1140_v63, %v841_v3  ;;  %v457_v50 = vpop.xlane.xlu1 %456  ;;  %1145 = vrsqrt.f32 %v1537_v1  ;;  %v752_v10 = vmul.f32 2.0, %v473_v5  ;;  %v411_v13 = vpop.xlane.xlu2 %410  ;;  %vm609_vm5 = vcmp.eq.f32.partialorder %v1537_v1, 0.0 }
 0x148   :  { %v554_v9 = vmul.f32 %v1142_v2, %v553_v4  ;;  %v744_v11 = vmul.f32 2.0, %v457_v50  ;;  %1147 = vrsqrt.f32 %v1541_v7  ;;  %v505_v21 = vmul.f32 2.0, %v411_v13 }
 0x149   :  { %v843_v8 = vmul.f32 0.5, %v842_v6  ;;  %v768_v14 = vadd.f32 %v752_v10, %v496_v46  ;;  %v610_v48 = vand.u32 2147483648, %v1537_v1  ;;  %vm657_vm6 = vcmp.eq.f32.partialorder %v1535_v0, 0.0 }
 0x14a   :  { %v760_v57 = vadd.f32 %v744_v11, %v488_v38  ;;  %v555_v16 = vmul.f32 0.5, %v554_v9  ;;  %v521_v29 = vadd.f32 %v505_v21, %v1555_v23 }
 0x14b   :  { %v844_v12 = vsub.f32 1.5, %v843_v8  ;;  %v1547_v20 = vmax.f32 %v768_v14, 1e-12 }
 0x14c   :  { %v1144_v15 = vpop.eup %1143  ;;  %v1550_v22 = vmax.f32 %v760_v57, 1e-12  ;;  %v556_v55 = vsub.f32 1.5, %v555_v16  ;;  %v1575_v40 = vmax.f32 %v521_v29, 1e-12  ;;  %v658_v57 = vand.u32 2147483648, %v1535_v0 }
 0x14d   :  { %v1146_v17 = vpop.eup %1145  ;;  %v845_v18 = vmul.f32 %v1140_v63, %v844_v12  ;;  %v649_v19 = vmul.f32 %v1144_v15, %v1535_v0  ;;  %1149 = vrsqrt.f32 %v1547_v20  ;;  %vm895_vm9 = vcmp.eq.f32.partialorder %v1547_v20, inf }
 0x14e   :  { %v601_v52 = vmul.f32 %v1146_v17, %v1537_v1  ;;  %v467_v25 = vpop.xlane.xlu0 %466  ;;  %v1558_v26 = vpop.eup %1147  ;;  %1151 = vrsqrt.f32 %v1550_v22  ;;  %v557_v35 = vmul.f32 %v1142_v2, %v556_v55  ;;  %vm897_vm10 = vcmp.eq.f32.partialorder %v1547_v20, 0.0 }
 0x14f   :  { %v650_v24 = vmul.f32 %v1144_v15, %v649_v19  ;;  %v846_v28 = vmul.f32 %v845_v18, %v1520_v43  ;;  %v697_v31 = vmul.f32 %v1558_v26, %v1541_v7  ;;  %v481_v33 = vpop.xlane.xlu1 %480  ;;  %v749_v41 = vmul.f32 2.0, %v467_v25  ;;  %v419_v63 = vpop.xlane.xlu2 %418 }
 0x150   :  { %v602_v27 = vmul.f32 %v1146_v17, %v601_v52  ;;  %v756_v46 = vmul.f32 2.0, %v481_v33  ;;  %v558_v59 = vmul.f32 %v557_v35, %v1522_v44  ;;  %1153 = vrsqrt.f32 %v1575_v40  ;;  %v1036_v52 = vld [vmem:[%s2115_s6 + $0x20] sm:$0xff] }
 0x151   :  { %v651_v53 = vmul.f32 0.5, %v650_v24  ;;  %v848_v39 = vsel %vm847_vm0, %v1520_v43, %v846_v28  ;;  %v698_v47 = vmul.f32 %v1558_v26, %v697_v31  ;;  %v765_v51 = vadd.f32 %v749_v41, %v493_v37 }
 0x152   :  { %v603_v30 = vmul.f32 0.5, %v602_v27  ;;  %v772_v62 = vadd.f32 %v756_v46, %v1532_v49  ;;  %v851_v2 = vsel %vm849_vm1, %v850_v34, %v848_v39  ;;  %v509_v10 = vmul.f32 2.0, %v419_v63  ;;  %v1040_v63 = vld [vmem:[%s2115_s6 + $0x40] sm:$0xff] }
 0x153   :  { %v652_v32 = vsub.f32 1.5, %v651_v53  ;;  %v1150_v38 = vpop.eup %1149  ;;  %v1590_v4 = vmax.f32 %v765_v51, 1e-12  ;;  %v699_v11 = vmul.f32 0.5, %v698_v47  ;;  %v560_v21 = vsel %vm559_vm4, %v1522_v44, %v558_v59 }
 0x154   :  { %v604_v58 = vsub.f32 1.5, %v603_v30  ;;  %v889_v45 = vmul.f32 %v1150_v38, %v1547_v20  ;;  %v1152_v54 = vpop.eup %1151  ;;  %v1596_v49 = vmax.f32 %v772_v62, 1e-12  ;;  %v898_v24 = vand.u32 2147483648, %v1547_v20 }
 0x155   :  { %v653_v56 = vmul.f32 %v1144_v15, %v652_v32  ;;  %v793_v3 = vmul.f32 %v1152_v54, %v1550_v22  ;;  %1155 = vrsqrt.f32 %v1590_v4  ;;  %v525_v55 = vadd.f32 %v509_v10, %v493_v37  ;;  %v1032_v10 = vld [vmem:[%s2115_s6] sm:$0xff] }
 0x156   :  { %v605_v42 = vmul.f32 %v1146_v17, %v604_v58  ;;  %v890_v61 = vmul.f32 %v1150_v38, %v889_v45  ;;  %v427_v5 = vpop.xlane.xlu0 %426  ;;  %1157 = vrsqrt.f32 %v1596_v49  ;;  %v1614_v19 = vpop.eup %1153  ;;  %v700_v28 = vsub.f32 1.5, %v699_v11 }
 0x157   :  { %v654_v6 = vmul.f32 %v653_v56, %v1535_v0  ;;  %v794_v9 = vmul.f32 %v1152_v54, %v793_v3  ;;  %v513_v14 = vmul.f32 2.0, %v427_v5  ;;  %v1623_v27 = vpop.xlane.xlu1 %434  ;;  %vm799_vm11 = vcmp.eq.f32.partialorder %v1550_v22, inf }
 0x158   :  { %v606_v60 = vmul.f32 %v605_v42, %v1537_v1  ;;  %v891_v8 = vmul.f32 0.5, %v890_v61  ;;  %v1630_v34 = vmax.f32 %v525_v55, 1e-12  ;;  %v565_v37 = vmul.f32 %v1614_v19, %v1575_v40 }
 0x159   :  { %v795_v15 = vmul.f32 0.5, %v794_v9  ;;  %v656_v16 = vsel %vm655_vm2, %v1535_v0, %v654_v6  ;;  %v802_v45 = vand.u32 2147483648, %v1550_v22  ;;  %v701_v51 = vmul.f32 %v1558_v26, %v700_v28 }
 0x15a   :  { %v608_v50 = vsel %vm607_vm3, %v1537_v1, %v606_v60  ;;  %v892_v13 = vsub.f32 1.5, %v891_v8  ;;  %v1608_v1 = vld [vmem:[%s2114_s2 + $0x48] sm:$0xff]  ;;  %v659_v32 = vsel %vm657_vm6, %v658_v57, %v656_v16  ;;  %1159 = vrsqrt.f32 %v1630_v34 }
 0x15b   :  { %v611_v43 = vsel %vm609_vm5, %v610_v48, %v608_v50  ;;  %v796_v25 = vsub.f32 1.5, %v795_v15  ;;  %v529_v30 = vadd.f32 %v513_v14, %v1608_v1  ;;  %v1156_v31 = vpop.eup %1155  ;;  %v459_v48 = vpop.xlane.xlu2 %458  ;;  %vm801_vm12 = vcmp.eq.f32.partialorder %v1550_v22, 0.0 }
 0x15c   :  { %v988_v12 = vsub.f32 %v611_v43, %v851_v2  ;;  %v893_v18 = vmul.f32 %v1150_v38, %v892_v13  ;;  %v853_v38 = vmul.f32 %v1156_v31, %v1590_v4  ;;  %v1158_v39 = vpop.eup %1157  ;;  %v566_v44 = vmul.f32 %v1614_v19, %v565_v37 }
 0x15d   :  { %v797_v33 = vmul.f32 %v1152_v54, %v796_v25  ;;  %v1642_v56 = vmax.f32 %v529_v30, 1e-12  ;;  %v937_v47 = vmul.f32 %v1158_v39, %v1596_v49  ;;  %v745_v26 = vmul.f32 2.0, %v459_v48 }
 0x15e   :  { %v1004_v17 = vadd.f32 1.0, %v988_v12  ;;  %v894_v29 = vmul.f32 %v893_v18, %v1547_v20  ;;  %v854_v46 = vmul.f32 %v1156_v31, %v853_v38  ;;  %v413_v6 = vpop.xlane.xlu0 %412  ;;  %v567_v14 = vmul.f32 0.5, %v566_v44  ;;  %v494_v44 = vld [vmem:[%s2114_s2 + $0x30] sm:$0xff] }
 0x15f   :  { %v798_v41 = vmul.f32 %v797_v33, %v1550_v22  ;;  %v938_v62 = vmul.f32 %v1158_v39, %v937_v47  ;;  %1161 = vrsqrt.f32 %v1642_v56  ;;  %v475_v43 = vpop.xlane.xlu1 %474  ;;  %v761_v57 = vadd.f32 %v745_v26, %v1555_v23 }
 0x160   :  { %v1020_v53 = vmax.f32 %v1004_v17, 0.0  ;;  %v896_v58 = vsel %vm895_vm9, %v1547_v20, %v894_v29  ;;  %v563_v20 = vsel %vm561_vm8, %v562_v36, %v560_v21  ;;  %v855_v61 = vmul.f32 0.5, %v854_v46  ;;  %v1160_v50 = vpop.eup %1159  ;;  %v1679_v21 = vld [vmem:[%s2114_s2 + $0x10] sm:$0xff] }
 0x161   :  { %v899_v0 = vsel %vm897_vm10, %v898_v24, %v896_v58  ;;  %v800_v54 = vsel %vm799_vm11, %v1550_v22, %v798_v41  ;;  %v939_v5 = vmul.f32 0.5, %v938_v62  ;;  %v702_v22 = vmul.f32 %v701_v51, %v1541_v7 }
 0x162   :  { %v1052_v35 = vmul.f32 %v1036_v52, %v1020_v53  ;;  %v992_v42 = vsub.f32 %v659_v32, %v899_v0  ;;  %v803_v60 = vsel %vm801_vm12, %v802_v45, %v800_v54  ;;  %v856_v3 = vsub.f32 1.5, %v855_v61 }
 0x163   :  { %v984_v2 = vsub.f32 %v563_v20, %v803_v60  ;;  %v940_v11 = vsub.f32 1.5, %v939_v5  ;;  %v613_v12 = vmul.f32 %v1160_v50, %v1630_v34  ;;  %v506_v15 = vmul.f32 2.0, %v413_v6  ;;  %v1044_v60 = vld [vmem:[%s2115_s6 + $0x60] sm:$0xff] }
 0x164   :  { %1069 = vst.msk [vmem:[%s2116_s7 + $0x20] sm:$0xff] %vm1064_vm7, %v1052_v35  ;;  %v1008_v59 = vadd.f32 1.0, %v992_v42  ;;  %v857_v16 = vmul.f32 %v1156_v31, %v856_v3  ;;  %v753_v52 = vmul.f32 2.0, %v475_v43  ;;  %v704_v23 = vsel %vm703_vm13, %v1541_v7, %v702_v22 }
 0x165   :  { %v1000_v8 = vadd.f32 1.0, %v984_v2  ;;  %v941_v17 = vmul.f32 %v1158_v39, %v940_v11  ;;  %v614_v18 = vmul.f32 %v1160_v50, %v613_v12  ;;  %v1681_v24 = vpop.eup %1161  ;;  %v706_v25 = vand.u32 2147483648, %v1541_v7  ;;  %v1745_v11 = vld [vmem:[%s2114_s2 + $0x70] sm:$0xff] }
 0x166   :  { %v1024_v36 = vmax.f32 %v1008_v59, 0.0  ;;  %vm943_vm15 = vcmp.eq.f32.partialorder %v1596_v49, inf  ;;  %vm945_vm0 = vcmp.eq.f32.partialorder %v1596_v49, 0.0  ;;  %v661_v29 = vmul.f32 %v1681_v24, %v1642_v56  ;;  %v421_v47 = vpop.xlane.xlu0 %420  ;;  %v437_v59 = vpop.xlane.xlu2 %436 }
 0x167   :  { %v1016_v13 = vmax.f32 %v1000_v8, 0.0  ;;  %v942_v28 = vmul.f32 %v941_v17, %v1596_v49  ;;  %v615_v53 = vmul.f32 0.5, %v614_v18  ;;  %v568_v30 = vsub.f32 1.5, %v567_v14  ;;  %v469_v5 = vpop.xlane.xlu1 %468  ;;  %v1037_v14 = vld [vmem:[%s2115_s6 + $0x28] sm:$0xff] }
 0x168   :  { %v1056_v9 = vmul.f32 %v1040_v63, %v1024_v36  ;;  %v946_v31 = vand.u32 2147483648, %v1596_v49  ;;  %v1697_v32 = vmax.f32 %v761_v57, 1e-12  ;;  %v522_v33 = vadd.f32 %v506_v15, %v1679_v21 }
 0x169   :  { %v1048_v55 = vmul.f32 %v1032_v10, %v1016_v13  ;;  %v858_v35 = vmul.f32 %v857_v16, %v1590_v4  ;;  %v944_v58 = vsel %vm943_vm15, %v1596_v49, %v942_v28  ;;  %v616_v37 = vsub.f32 1.5, %v615_v53 }
 0x16a   :  { %1073 = vst.msk [vmem:[%s2116_s7 + $0x40] sm:$0xff] %vm1064_vm7, %v1056_v9  ;;  %v769_v38 = vadd.f32 %v753_v52, %v1608_v1  ;;  %v707_v39 = vsel %vm705_vm14, %v706_v25, %v704_v23  ;;  %v947_v0 = vsel %vm945_vm0, %v946_v31, %v944_v58  ;;  %v662_v41 = vmul.f32 %v1681_v24, %v661_v29 }
 0x16b   :  { %1065 = vst.msk [vmem:[%s2116_s7] sm:$0xff] %vm1064_vm7, %v1048_v55  ;;  %1163 = vrsqrt.f32 %v1697_v32  ;;  %vm859_vm1 = vcmp.eq.f32.partialorder %v1590_v4, inf  ;;  %v862_v42 = vand.u32 2147483648, %v1590_v4  ;;  %v996_v45 = vsub.f32 %v707_v39, %v947_v0 }
 0x16c   :  { %v617_v46 = vmul.f32 %v1160_v50, %v616_v37  ;;  %v569_v49 = vmul.f32 %v1614_v19, %v568_v30  ;;  %v517_v48 = vmul.f32 2.0, %v1623_v27  ;;  %v1711_v1 = vmax.f32 %v522_v33, 1e-12  ;;  %v1725_v27 = vld [vmem:[%s2114_s2 + $0x68] sm:$0xff] }
 0x16d   :  { %v1713_v7 = vmax.f32 %v769_v38, 1e-12  ;;  %v860_v20 = vsel %vm859_vm1, %v1590_v4, %v858_v35  ;;  %v1012_v51 = vadd.f32 1.0, %v996_v45  ;;  %vm619_vm2 = vcmp.eq.f32.partialorder %v1630_v34, inf  ;;  %v498_v45 = vld [vmem:[%s2114_s2 + $0x50] sm:$0xff] }
 0x16e   :  { %v618_v54 = vmul.f32 %v617_v46, %v1630_v34  ;;  %v622_v19 = vand.u32 2147483648, %v1630_v34  ;;  %v663_v61 = vmul.f32 0.5, %v662_v41  ;;  %1165 = vrsqrt.f32 %v1711_v1  ;;  %v477_v33 = vpop.xlane.xlu2 %476  ;;  %v461_v58 = vpop.xlane.xlu0 %460 }
 0x16f   :  { %v510_v62 = vmul.f32 2.0, %v421_v47  ;;  %vm861_vm3 = vcmp.eq.f32.partialorder %v1590_v4, 0.0  ;;  %v1028_v63 = vmax.f32 %v1012_v51, 0.0  ;;  %vm621_vm4 = vcmp.eq.f32.partialorder %v1630_v34, 0.0 }
 0x170   :  { %v620_v2 = vsel %vm619_vm2, %v1630_v34, %v618_v54  ;;  %v863_v36 = vsel %vm861_vm3, %v862_v42, %v860_v20  ;;  %1167 = vrsqrt.f32 %v1713_v7  ;;  %v570_v6 = vmul.f32 %v569_v49, %v1575_v40  ;;  %v429_v54 = vpop.xlane.xlu1 %428 }
 0x171   :  { %v1164_v26 = vpop.eup %1163  ;;  %v623_v3 = vsel %vm621_vm4, %v622_v19, %v620_v2  ;;  %v1060_v50 = vmul.f32 %v1044_v60, %v1028_v63  ;;  %v533_v4 = vadd.f32 %v517_v48, %v1725_v27  ;;  %v664_v8 = vsub.f32 1.5, %v663_v61 }
 0x172   :  { %v989_v22 = vsub.f32 %v623_v3, %v863_v36  ;;  %v805_v43 = vmul.f32 %v1164_v26, %v1697_v32  ;;  %v518_v34 = vmul.f32 2.0, %v437_v59  ;;  %v526_v9 = vadd.f32 %v510_v62, %v494_v44 }
 0x173   :  { %1077 = vst.msk [vmem:[%s2116_s7 + $0x60] sm:$0xff] %vm1064_vm7, %v1060_v50  ;;  %v750_v12 = vmul.f32 2.0, %v469_v5  ;;  %vm571_vm5 = vcmp.eq.f32.partialorder %v1575_v40, inf  ;;  %v1756_v18 = vmax.f32 %v533_v4, 1e-12  ;;  %v665_v23 = vmul.f32 %v1681_v24, %v664_v8 }
 0x174   :  { %v1005_v10 = vadd.f32 1.0, %v989_v22  ;;  %v1747_v13 = vpop.eup %1165  ;;  %v806_v57 = vmul.f32 %v1164_v26, %v805_v43  ;;  %v1753_v15 = vmax.f32 %v526_v9, 1e-12  ;;  %v572_v16 = vsel %vm571_vm5, %v1575_v40, %v570_v6  ;;  %v1033_v9 = vld [vmem:[%s2115_s6 + $0x8] sm:$0xff] }
 0x175   :  { %v534_v55 = vadd.f32 %v518_v34, %v1745_v11  ;;  %v766_v28 = vadd.f32 %v750_v12, %v494_v44  ;;  %v574_v53 = vand.u32 2147483648, %v1575_v40  ;;  %v577_v30 = vmul.f32 %v1747_v13, %v1711_v1 }
 0x176   :  { %v1021_v17 = vmax.f32 %v1005_v10, 0.0  ;;  %v1168_v52 = vpop.eup %1167  ;;  %v807_v25 = vmul.f32 0.5, %v806_v57  ;;  %vm573_vm6 = vcmp.eq.f32.partialorder %v1575_v40, 0.0  ;;  %1169 = vrsqrt.f32 %v1753_v15 }
 0x177   :  { %v901_v31 = vmul.f32 %v1168_v52, %v1713_v7  ;;  %v575_v24 = vsel %vm573_vm6, %v574_v53, %v572_v16  ;;  %vm667_vm8 = vcmp.eq.f32.partialorder %v1642_v56, inf  ;;  %1171 = vrsqrt.f32 %v1756_v18 }
 0x178   :  { %v1053_v29 = vmul.f32 %v1037_v14, %v1021_v17  ;;  %v808_v35 = vsub.f32 1.5, %v807_v25  ;;  %v666_v38 = vmul.f32 %v665_v23, %v1642_v56  ;;  %v1773_v0 = vmax.f32 %v534_v55, 1e-12 }
 0x179   :  { %v902_v37 = vmul.f32 %v1168_v52, %v901_v31  ;;  %v1775_v40 = vmax.f32 %v766_v28, 1e-12  ;;  %v578_v41 = vmul.f32 %v1747_v13, %v577_v30  ;;  %v754_v46 = vmul.f32 2.0, %v477_v33  ;;  %v439_v31 = vpop.xlane.xlu0 %438 }
 0x17a   :  { %1070 = vst.msk [vmem:[%s2116_s7 + $0x28] sm:$0xff] %vm1064_vm7, %v1053_v29  ;;  %v809_v39 = vmul.f32 %v1164_v26, %v808_v35  ;;  %v746_v47 = vmul.f32 2.0, %v461_v58  ;;  %vm669_vm9 = vcmp.eq.f32.partialorder %v1642_v56, 0.0  ;;  %v670_v49 = vand.u32 2147483648, %v1642_v56  ;;  %v1041_v35 = vld [vmem:[%s2115_s6 + $0x48] sm:$0xff] }
 0x17b   :  { %v903_v42 = vmul.f32 0.5, %v902_v37  ;;  %1173 = vrsqrt.f32 %v1775_v40  ;;  %vm811_vm10 = vcmp.eq.f32.partialorder %v1697_v32, inf  ;;  %vm813_vm11 = vcmp.eq.f32.partialorder %v1697_v32, 0.0 }
 0x17c   :  { %v810_v48 = vmul.f32 %v809_v39, %v1697_v32  ;;  %v814_v20 = vand.u32 2147483648, %v1697_v32  ;;  %v1170_v59 = vpop.eup %1169  ;;  %v668_v60 = vsel %vm667_vm8, %v1642_v56, %v666_v38  ;;  %v770_v61 = vadd.f32 %v754_v46, %v498_v45 }
 0x17d   :  { %v904_v51 = vsub.f32 1.5, %v903_v42  ;;  %v762_v62 = vadd.f32 %v746_v47, %v1679_v21  ;;  %v1793_v63 = vpop.eup %1171  ;;  %v579_v44 = vmul.f32 0.5, %v578_v41  ;;  %1175 = vrsqrt.f32 %v1773_v0  ;;  %v1836_v42 = vld [vmem:[%s2114_s2 + $0x18] sm:$0xff] }
 0x17e   :  { %v812_v19 = vsel %vm811_vm10, %v1697_v32, %v810_v48  ;;  %v625_v3 = vmul.f32 %v1170_v59, %v1753_v15  ;;  %v1797_v5 = vmax.f32 %v770_v61, 1e-12  ;;  %v514_v6 = vmul.f32 2.0, %v429_v54  ;;  %v415_v32 = vpop.xlane.xlu2 %414 }
 0x17f   :  { %v815_v2 = vsel %vm813_vm11, %v814_v20, %v812_v19  ;;  %v905_v26 = vmul.f32 %v1168_v52, %v904_v51  ;;  %vm907_vm12 = vcmp.eq.f32.partialorder %v1713_v7, inf  ;;  %vm909_vm13 = vcmp.eq.f32.partialorder %v1713_v7, 0.0  ;;  %v423_v20 = vpop.xlane.xlu1 %422 }
 0x180   :  { %v985_v36 = vsub.f32 %v575_v24, %v815_v2  ;;  %v910_v21 = vand.u32 2147483648, %v1713_v7  ;;  %v626_v8 = vmul.f32 %v1170_v59, %v625_v3  ;;  %1177 = vrsqrt.f32 %v1797_v5 }
 0x181   :  { %v906_v50 = vmul.f32 %v905_v26, %v1713_v7  ;;  %v1174_v22 = vpop.eup %1173  ;;  %v1804_v43 = vmax.f32 %v762_v62, 1e-12  ;;  %v671_v34 = vsel %vm669_vm9, %v670_v49, %v668_v60  ;;  %v580_v10 = vsub.f32 1.5, %v579_v44 }
 0x182   :  { %v1001_v4 = vadd.f32 1.0, %v985_v36  ;;  %v865_v14 = vmul.f32 %v1174_v22, %v1775_v40  ;;  %v627_v17 = vmul.f32 0.5, %v626_v8  ;;  %v530_v52 = vadd.f32 %v514_v6, %v498_v45  ;;  %v495_v8 = vld [vmem:[%s2114_s2 + $0x38] sm:$0xff] }
 0x183   :  { %v908_v12 = vsel %vm907_vm12, %v1713_v7, %v906_v50  ;;  %v1813_v23 = vpop.eup %1175  ;;  %1179 = vrsqrt.f32 %v1804_v43  ;;  %v709_v53 = vmul.f32 %v1793_v63, %v1756_v18  ;;  %v581_v29 = vmul.f32 %v1747_v13, %v580_v10 }
 0x184   :  { %v1017_v57 = vmax.f32 %v1001_v4, 0.0  ;;  %v911_v16 = vsel %vm909_vm13, %v910_v21, %v908_v12  ;;  %v866_v55 = vmul.f32 %v1174_v22, %v865_v14  ;;  %v628_v56 = vsub.f32 1.5, %v627_v17  ;;  %v1865_v4 = vld [vmem:[%s2114_s2 + $0x78] sm:$0xff]  ;;  %v479_v17 = vpop.xlane.xlu0 %478 }
 0x185   :  { %v993_v25 = vsub.f32 %v671_v34, %v911_v16  ;;  %v721_v58 = vmul.f32 %v1813_v23, %v1773_v0  ;;  %v1828_v37 = vmax.f32 %v530_v52, 1e-12  ;;  %v507_v13 = vmul.f32 2.0, %v415_v32 }
 0x186   :  { %v1049_v28 = vmul.f32 %v1033_v9, %v1017_v57  ;;  %v867_v30 = vmul.f32 0.5, %v866_v55  ;;  %v1178_v33 = vpop.eup %1177  ;;  %v629_v24 = vmul.f32 %v1170_v59, %v628_v56  ;;  %vm583_vm14 = vcmp.eq.f32.partialorder %v1711_v1, inf  ;;  %v471_v51 = vpop.xlane.xlu2 %470 }
 0x187   :  { %v1009_v7 = vadd.f32 1.0, %v993_v25  ;;  %vm631_vm15 = vcmp.eq.f32.partialorder %v1753_v15, inf  ;;  %v913_v41 = vmul.f32 %v1178_v33, %v1797_v5  ;;  %vm633_vm0 = vcmp.eq.f32.partialorder %v1753_v15, 0.0 }
 0x188   :  { %1066 = vst.msk [vmem:[%s2116_s7 + $0x8] sm:$0xff] %vm1064_vm7, %v1049_v28  ;;  %v868_v39 = vsub.f32 1.5, %v867_v30  ;;  %v630_v45 = vmul.f32 %v629_v24, %v1753_v15  ;;  %v634_v46 = vand.u32 2147483648, %v1753_v15  ;;  %1181 = vrsqrt.f32 %v1828_v37 }
 0x189   :  { %v1025_v38 = vmax.f32 %v1009_v7, 0.0  ;;  %vm871_vm1 = vcmp.eq.f32.partialorder %v1775_v40, inf  ;;  %v914_v48 = vmul.f32 %v1178_v33, %v913_v41  ;;  %v1180_v54 = vpop.eup %1179  ;;  %v582_v59 = vmul.f32 %v581_v29, %v1711_v1 }
 0x18a   :  { %v869_v49 = vmul.f32 %v1174_v22, %v868_v39  ;;  %v722_v60 = vmul.f32 %v1813_v23, %v721_v58  ;;  %v874_v19 = vand.u32 2147483648, %v1775_v40  ;;  %v523_v61 = vadd.f32 %v507_v13, %v1836_v42 }
 0x18b   :  { %v1057_v47 = vmul.f32 %v1041_v35, %v1025_v38  ;;  %v632_v62 = vsel %vm631_vm15, %v1753_v15, %v630_v45  ;;  %v915_v44 = vmul.f32 0.5, %v914_v48  ;;  %v817_v26 = vmul.f32 %v1180_v54, %v1804_v43 }
 0x18c   :  { %v870_v2 = vmul.f32 %v869_v49, %v1775_v40  ;;  %v1856_v36 = vmax.f32 %v523_v61, 1e-12  ;;  %v519_v3 = vmul.f32 2.0, %v439_v31  ;;  %v511_v6 = vmul.f32 2.0, %v423_v20  ;;  %v1038_v31 = vld [vmem:[%s2115_s6 + $0x30] sm:$0xff] }
 0x18d   :  { %1074 = vst.msk [vmem:[%s2116_s7 + $0x48] sm:$0xff] %vm1064_vm7, %v1057_v47  ;;  %v751_v50 = vmul.f32 2.0, %v471_v51  ;;  %vm873_vm2 = vcmp.eq.f32.partialorder %v1775_v40, 0.0  ;;  %v916_v32 = vsub.f32 1.5, %v915_v44  ;;  %v818_v22 = vmul.f32 %v1180_v54, %v817_v26 }
 0x18e   :  { %v872_v21 = vsel %vm871_vm1, %v1775_v40, %v870_v2  ;;  %v1182_v34 = vpop.eup %1181  ;;  %v710_v9 = vmul.f32 %v1793_v63, %v709_v53  ;;  %v1871_v10 = vmul.f32 0.5, %v722_v60  ;;  %v635_v12 = vsel %vm633_vm0, %v634_v46, %v632_v62 }
 0x18f   :  { %v875_v40 = vsel %vm873_vm2, %v874_v19, %v872_v21  ;;  %v819_v57 = vmul.f32 0.5, %v818_v22  ;;  %v673_v16 = vmul.f32 %v1182_v34, %v1828_v37  ;;  %1183 = vrsqrt.f32 %v1856_v36  ;;  %v463_v19 = vpop.xlane.xlu1 %462  ;;  %v431_v21 = vpop.xlane.xlu2 %430 }
 0x190   :  { %v990_v14 = vsub.f32 %v635_v12, %v875_v40  ;;  %v584_v52 = vsel %vm583_vm14, %v1711_v1, %v582_v59  ;;  %v535_v25 = vadd.f32 %v519_v3, %v1865_v4  ;;  %v527_v55 = vadd.f32 %v511_v6, %v495_v8 }
 0x191   :  { %v767_v28 = vadd.f32 %v751_v50, %v495_v8  ;;  %v917_v53 = vmul.f32 %v1178_v33, %v916_v32  ;;  %v820_v15 = vsub.f32 1.5, %v819_v57  ;;  %v674_v29 = vmul.f32 %v1182_v34, %v673_v16  ;;  %v1892_v33 = vld [vmem:[%s2114_s2 + $0x58] sm:$0xff]  ;;  %v485_v32 = vpop.xlane.xlu0 %484 }
 0x192   :  { %v1006_v56 = vadd.f32 1.0, %v990_v14  ;;  %v1881_v7 = vmul.f32 0.5, %v710_v9  ;;  %vm585_vm3 = vcmp.eq.f32.partialorder %v1711_v1, 0.0  ;;  %v586_v30 = vand.u32 2147483648, %v1711_v1 }
 0x193   :  { %v755_v35 = vmul.f32 2.0, %v479_v17  ;;  %v724_v58 = vsub.f32 1.5, %v1871_v10  ;;  %v821_v13 = vmul.f32 %v1180_v54, %v820_v15  ;;  %v675_v38 = vmul.f32 0.5, %v674_v29  ;;  %v1034_v10 = vld [vmem:[%s2115_s6 + $0x10] sm:$0xff] }
 0x194   :  { %v1022_v24 = vmax.f32 %v1006_v56, 0.0  ;;  %v587_v39 = vsel %vm585_vm3, %v586_v30, %v584_v52  ;;  %v1894_v41 = vmax.f32 %v535_v25, 1e-12  ;;  %v1896_v45 = vmax.f32 %v527_v55, 1e-12  ;;  %v1042_v29 = vld [vmem:[%s2115_s6 + $0x50] sm:$0xff] }
 0x195   :  { %v1898_v1 = vmax.f32 %v767_v28, 1e-12  ;;  %v1900_v46 = vpop.eup %1183  ;;  %v918_v49 = vmul.f32 %v917_v53, %v1797_v5  ;;  %v822_v48 = vmul.f32 %v821_v13, %v1804_v43  ;;  %v676_v20 = vsub.f32 1.5, %v675_v38 }
 0x196   :  { %v1054_v47 = vmul.f32 %v1038_v31, %v1022_v24  ;;  %vm823_vm4 = vcmp.eq.f32.partialorder %v1804_v43, inf  ;;  %v826_v51 = vand.u32 2147483648, %v1804_v43  ;;  %1185 = vrsqrt.f32 %v1896_v45 }
 0x197   :  { %v771_v54 = vadd.f32 %v755_v35, %v1892_v33  ;;  %v824_v59 = vsel %vm823_vm4, %v1804_v43, %v822_v48  ;;  %vm825_vm5 = vcmp.eq.f32.partialorder %v1804_v43, 0.0  ;;  %v677_v60 = vmul.f32 %v1182_v34, %v676_v20  ;;  %v487_v20 = vpop.xlane.xlu1 %486 }
 0x198   :  { %1071 = vst.msk [vmem:[%s2116_s7 + $0x30] sm:$0xff] %vm1064_vm7, %v1054_v47  ;;  %1187 = vrsqrt.f32 %v1898_v1  ;;  %vm919_vm6 = vcmp.eq.f32.partialorder %v1797_v5, inf  ;;  %v922_v61 = vand.u32 2147483648, %v1797_v5  ;;  %v827_v62 = vsel %vm825_vm5, %v826_v51, %v824_v59 }
 0x199   :  { %v589_v2 = vmul.f32 %v1900_v46, %v1856_v36  ;;  %v920_v44 = vsel %vm919_vm6, %v1797_v5, %v918_v49  ;;  %v986_v26 = vsub.f32 %v587_v39, %v827_v62  ;;  %v678_v3 = vmul.f32 %v677_v60, %v1828_v37 }
 0x19a   :  { %1189 = vrsqrt.f32 %v1894_v41  ;;  %vm679_vm8 = vcmp.eq.f32.partialorder %v1828_v37, inf  ;;  %v682_v43 = vand.u32 2147483648, %v1828_v37  ;;  %v1924_v6 = vmax.f32 %v771_v54, 1e-12 }
 0x19b   :  { %v747_v50 = vmul.f32 2.0, %v463_v19  ;;  %vm921_vm9 = vcmp.eq.f32.partialorder %v1797_v5, 0.0  ;;  %v1002_v22 = vadd.f32 1.0, %v986_v26  ;;  %v680_v8 = vsel %vm679_vm8, %v1828_v37, %v678_v3 }
 0x19c   :  { %vm681_vm10 = vcmp.eq.f32.partialorder %v1828_v37, 0.0  ;;  %v1186_v34 = vpop.eup %1185  ;;  %v923_v9 = vsel %vm921_vm9, %v922_v61, %v920_v44  ;;  %v590_v40 = vmul.f32 %v1900_v46, %v589_v2  ;;  %1191 = vrsqrt.f32 %v1924_v6 }
 0x19d   :  { %v683_v12 = vsel %vm681_vm10, %v682_v43, %v680_v8  ;;  %v1018_v57 = vmax.f32 %v1002_v22, 0.0  ;;  %v515_v5 = vmul.f32 2.0, %v431_v21  ;;  %v758_v17 = vmul.f32 2.0, %v485_v32 }
 0x19e   :  { %v1188_v14 = vpop.eup %1187  ;;  %v994_v16 = vsub.f32 %v683_v12, %v923_v9  ;;  %v637_v52 = vmul.f32 %v1186_v34, %v1896_v45  ;;  %v763_v25 = vadd.f32 %v747_v50, %v1836_v42  ;;  %v712_v28 = vsub.f32 1.5, %v1881_v7  ;;  %v483_v12 = vpop.xlane.xlu2 %482 }
 0x19f   :  { %v877_v37 = vmul.f32 %v1188_v14, %v1898_v1  ;;  %v1050_v56 = vmul.f32 %v1034_v10, %v1018_v57  ;;  %v725_v15 = vmul.f32 %v1813_v23, %v724_v58  ;;  %v591_v24 = vmul.f32 0.5, %v590_v40 }
 0x1a0   :  { %v1937_v55 = vpop.eup %1189  ;;  %v1010_v53 = vadd.f32 1.0, %v994_v16  ;;  %v638_v30 = vmul.f32 %v1186_v34, %v637_v52  ;;  %v1944_v35 = vmax.f32 %v763_v25, 1e-12  ;;  %v531_v7 = vadd.f32 %v515_v5, %v1892_v33 }
 0x1a1   :  { %v878_v31 = vmul.f32 %v1188_v14, %v877_v37  ;;  %1067 = vst.msk [vmem:[%s2116_s7 + $0x10] sm:$0xff] %vm1064_vm7, %v1050_v56  ;;  %v774_v13 = vadd.f32 %v758_v17, %v1745_v11  ;;  %v733_v58 = vmul.f32 %v1937_v55, %v1894_v41  ;;  %v1956_v47 = vmul.f32 %v1793_v63, %v712_v28 }
 0x1a2   :  { %v1026_v42 = vmax.f32 %v1010_v53, 0.0  ;;  %v1192_v23 = vpop.eup %1191  ;;  %v639_v38 = vmul.f32 0.5, %v638_v30  ;;  %1193 = vrsqrt.f32 %v1944_v35  ;;  %vm727_vm11 = vcmp.eq.f32.partialorder %v1773_v0, inf }
 0x1a3   :  { %v879_v39 = vmul.f32 0.5, %v878_v31  ;;  %v925_v48 = vmul.f32 %v1192_v23, %v1924_v6  ;;  %v726_v33 = vmul.f32 %v725_v15, %v1773_v0  ;;  %vm643_vm12 = vcmp.eq.f32.partialorder %v1896_v45, inf  ;;  %v1039_v15 = vld [vmem:[%s2115_s6 + $0x38] sm:$0xff] }
 0x1a4   :  { %v1058_v49 = vmul.f32 %v1042_v29, %v1026_v42  ;;  %v640_v11 = vsub.f32 1.5, %v639_v38  ;;  %v592_v54 = vsub.f32 1.5, %v591_v24  ;;  %v1966_v59 = vmax.f32 %v531_v7, 1e-12 }
 0x1a5   :  { %v880_v51 = vsub.f32 1.5, %v879_v39  ;;  %v926_v63 = vmul.f32 %v1192_v23, %v925_v48  ;;  %v1968_v60 = vmax.f32 %v774_v13, 1e-12  ;;  %v734_v19 = vmul.f32 %v1937_v55, %v733_v58 }
 0x1a6   :  { %1075 = vst.msk [vmem:[%s2116_s7 + $0x50] sm:$0xff] %vm1064_vm7, %v1058_v49  ;;  %v641_v61 = vmul.f32 %v1186_v34, %v640_v11  ;;  %v759_v2 = vmul.f32 2.0, %v487_v20  ;;  %vm645_vm13 = vcmp.eq.f32.partialorder %v1896_v45, 0.0  ;;  %v646_v44 = vand.u32 2147483648, %v1896_v45 }
 0x1a7   :  { %v881_v62 = vmul.f32 %v1188_v14, %v880_v51  ;;  %v927_v26 = vmul.f32 0.5, %v926_v63  ;;  %1195 = vrsqrt.f32 %v1966_v59  ;;  %vm883_vm14 = vcmp.eq.f32.partialorder %v1898_v1, inf }
 0x1a8   :  { %v1194_v3 = vpop.eup %1193  ;;  %v642_v43 = vmul.f32 %v641_v61, %v1896_v45  ;;  %1197 = vrsqrt.f32 %v1968_v60  ;;  %v593_v21 = vmul.f32 %v1900_v46, %v592_v54  ;;  %vm885_vm15 = vcmp.eq.f32.partialorder %v1898_v1, 0.0 }
 0x1a9   :  { %v882_v50 = vmul.f32 %v881_v62, %v1898_v1  ;;  %v886_v32 = vand.u32 2147483648, %v1898_v1  ;;  %v829_v22 = vmul.f32 %v1194_v3, %v1944_v35  ;;  %v735_v8 = vmul.f32 0.5, %v734_v19 }
 0x1aa   :  { %v644_v34 = vsel %vm643_vm12, %v1896_v45, %v642_v43  ;;  %v775_v10 = vadd.f32 %v759_v2, %v1865_v4  ;;  %v928_v14 = vsub.f32 1.5, %v927_v26  ;;  %v1992_v16 = vsel %vm727_vm11, %v1773_v0, %v726_v33 }
 0x1ab   :  { %v884_v9 = vsel %vm883_vm14, %v1898_v1, %v882_v50  ;;  %v647_v40 = vsel %vm645_vm13, %v646_v44, %v644_v34  ;;  %v830_v57 = vmul.f32 %v1194_v3, %v829_v22  ;;  %v730_v5 = vand.u32 2147483648, %v1773_v0 }
 0x1ac   :  { %v887_v46 = vsel %vm885_vm15, %v886_v32, %v884_v9  ;;  %v1995_v52 = vmax.f32 %v775_v10, 1e-12  ;;  %v594_v4 = vmul.f32 %v593_v21, %v1856_v36  ;;  %vm595_vm0 = vcmp.eq.f32.partialorder %v1856_v36, inf  ;;  %v1035_v10 = vld [vmem:[%s2115_s6 + $0x18] sm:$0xff] }
 0x1ad   :  { %v991_v17 = vsub.f32 %v647_v40, %v887_v46  ;;  %v1196_v1 = vpop.eup %1195  ;;  %v831_v45 = vmul.f32 0.5, %v830_v57  ;;  %v757_v37 = vmul.f32 2.0, %v483_v12  ;;  %v736_v28 = vsub.f32 1.5, %v735_v8 }
 0x1ae   :  { %v1198_v25 = vpop.eup %1197  ;;  %v685_v53 = vmul.f32 %v1196_v1, %v1966_v59  ;;  %1199 = vrsqrt.f32 %v1995_v52  ;;  %vm597_vm1 = vcmp.eq.f32.partialorder %v1856_v36, 0.0  ;;  %v929_v29 = vmul.f32 %v1192_v23, %v928_v14 }
 0x1af   :  { %v1007_v56 = vadd.f32 1.0, %v991_v17  ;;  %v832_v30 = vsub.f32 1.5, %v831_v45  ;;  %v961_v31 = vmul.f32 %v1198_v25, %v1968_v60  ;;  %v598_v42 = vand.u32 2147483648, %v1856_v36 }
 0x1b0   :  { %vm931_vm2 = vcmp.eq.f32.partialorder %v1924_v6, inf  ;;  %v686_v7 = vmul.f32 %v1196_v1, %v685_v53  ;;  %vm933_vm3 = vcmp.eq.f32.partialorder %v1924_v6, 0.0  ;;  %v934_v13 = vand.u32 2147483648, %v1924_v6 }
 0x1b1   :  { %v1023_v24 = vmax.f32 %v1007_v56, 0.0  ;;  %v833_v58 = vmul.f32 %v1194_v3, %v832_v30  ;;  %v962_v38 = vmul.f32 %v1198_v25, %v961_v31  ;;  %v773_v39 = vadd.f32 %v757_v37, %v1725_v27  ;;  %v1046_v30 = vld [vmem:[%s2115_s6 + $0x70] sm:$0xff] }
 0x1b2   :  { %v596_v23 = vsel %vm595_vm0, %v1856_v36, %v594_v4  ;;  %v737_v49 = vmul.f32 %v1937_v55, %v736_v28  ;;  %v687_v20 = vmul.f32 0.5, %v686_v7  ;;  %vm729_vm4 = vcmp.eq.f32.partialorder %v1773_v0, 0.0  ;;  %v1043_v0 = vld [vmem:[%s2115_s6 + $0x58] sm:$0xff] }
 0x1b3   :  { %v1055_v48 = vmul.f32 %v1039_v15, %v1023_v24  ;;  %v930_v33 = vmul.f32 %v929_v29, %v1924_v6  ;;  %v834_v11 = vmul.f32 %v833_v58, %v1944_v35  ;;  %v963_v51 = vmul.f32 0.5, %v962_v38 }
 0x1b4   :  { %v2018_v54 = vmax.f32 %v773_v39, 1e-12  ;;  %v1200_v63 = vpop.eup %1199  ;;  %vm835_vm5 = vcmp.eq.f32.partialorder %v1944_v35, inf  ;;  %vm837_vm6 = vcmp.eq.f32.partialorder %v1944_v35, 0.0  ;;  %v838_v27 = vand.u32 2147483648, %v1944_v35 }
 0x1b5   :  { %1072 = vst.msk [vmem:[%s2116_s7 + $0x38] sm:$0xff] %vm1064_vm7, %v1055_v48  ;;  %v688_v55 = vsub.f32 1.5, %v687_v20  ;;  %v836_v19 = vsel %vm835_vm5, %v1944_v35, %v834_v11  ;;  %v964_v61 = vsub.f32 1.5, %v963_v51  ;;  %v973_v62 = vmul.f32 %v1200_v63, %v1995_v52  ;;  %v1047_v20 = vld [vmem:[%s2115_s6 + $0x78] sm:$0xff] }
 0x1b6   :  { %1201 = vrsqrt.f32 %v2018_v54  ;;  %v599_v2 = vsel %vm597_vm1, %v598_v42, %v596_v23  ;;  %v738_v44 = vmul.f32 %v737_v49, %v1894_v41  ;;  %v839_v26 = vsel %vm837_vm6, %v838_v27, %v836_v19 }
 0x1b7   :  { %v689_v3 = vmul.f32 %v1196_v1, %v688_v55  ;;  %v932_v43 = vsel %vm931_vm2, %v1924_v6, %v930_v33  ;;  %v987_v50 = vsub.f32 %v599_v2, %v839_v26  ;;  %v965_v21 = vmul.f32 %v1198_v25, %v964_v61 }
 0x1b8   :  { %v974_v32 = vmul.f32 %v1200_v63, %v973_v62  ;;  %vm691_vm8 = vcmp.eq.f32.partialorder %v1966_v59, inf  ;;  %vm693_vm9 = vcmp.eq.f32.partialorder %v1966_v59, 0.0  ;;  %v694_v36 = vand.u32 2147483648, %v1966_v59 }
 0x1b9   :  { %v690_v35 = vmul.f32 %v689_v3, %v1966_v59  ;;  %v1003_v22 = vadd.f32 1.0, %v987_v50  ;;  %v966_v8 = vmul.f32 %v965_v21, %v1968_v60  ;;  %vm967_vm10 = vcmp.eq.f32.partialorder %v1968_v60, inf }
 0x1ba   :  { %v975_v34 = vmul.f32 0.5, %v974_v32  ;;  %v935_v9 = vsel %vm933_vm3, %v934_v13, %v932_v43  ;;  %vm969_vm11 = vcmp.eq.f32.partialorder %v1968_v60, 0.0  ;;  %v970_v40 = vand.u32 2147483648, %v1968_v60 }
 0x1bb   :  { %v692_v12 = vsel %vm691_vm8, %v1966_v59, %v690_v35  ;;  %v1019_v14 = vmax.f32 %v1003_v22, 0.0  ;;  %v968_v17 = vsel %vm967_vm10, %v1968_v60, %v966_v8  ;;  %v731_v6 = vsel %vm729_vm4, %v730_v5, %v1992_v16 }
 0x1bc   :  { %v1202_v46 = vpop.eup %1201  ;;  %v695_v57 = vsel %vm693_vm9, %v694_v36, %v692_v12  ;;  %v976_v1 = vsub.f32 1.5, %v975_v34  ;;  %v971_v45 = vsel %vm969_vm11, %v970_v40, %v968_v17  ;;  %v714_v56 = vmul.f32 %v1956_v47, %v1756_v18 }
 0x1bd   :  { %v995_v4 = vsub.f32 %v695_v57, %v935_v9  ;;  %v949_v59 = vmul.f32 %v1202_v46, %v2018_v54  ;;  %v1051_v37 = vmul.f32 %v1035_v10, %v1019_v14  ;;  %v998_v25 = vsub.f32 %v731_v6, %v971_v45 }
 0x1be   :  { %v977_v28 = vmul.f32 %v1200_v63, %v976_v1  ;;  %vm739_vm12 = vcmp.eq.f32.partialorder %v1894_v41, inf  ;;  %v742_v29 = vand.u32 2147483648, %v1894_v41  ;;  %vm979_vm13 = vcmp.eq.f32.partialorder %v1995_v52, inf }
 0x1bf   :  { %v1011_v60 = vadd.f32 1.0, %v995_v4  ;;  %v950_v53 = vmul.f32 %v1202_v46, %v949_v59  ;;  %v740_v15 = vsel %vm739_vm12, %v1894_v41, %v738_v44  ;;  %1068 = vst.msk [vmem:[%s2116_s7 + $0x18] sm:$0xff] %vm1064_vm7, %v1051_v37  ;;  %v1014_v16 = vadd.f32 1.0, %v998_v25  ;;  %v1045_v44 = vld [vmem:[%s2115_s6 + $0x68] sm:$0xff] }
 0x1c0   :  { %v978_v47 = vmul.f32 %v977_v28, %v1995_v52  ;;  %v982_v31 = vand.u32 2147483648, %v1995_v52  ;;  %vm741_vm14 = vcmp.eq.f32.partialorder %v1894_v41, 0.0  ;;  %vm981_vm15 = vcmp.eq.f32.partialorder %v1995_v52, 0.0 }
 0x1c1   :  { %v1027_v5 = vmax.f32 %v1011_v60, 0.0  ;;  %v951_v42 = vmul.f32 0.5, %v950_v53  ;;  %v1030_v24 = vmax.f32 %v1014_v16, 0.0  ;;  %v743_v13 = vsel %vm741_vm14, %v742_v29, %v740_v15 }
 0x1c2   :  { %v980_v7 = vsel %vm979_vm13, %v1995_v52, %v978_v47  ;;  %vm715_vm0 = vcmp.eq.f32.partialorder %v1756_v18, inf  ;;  %v718_v11 = vand.u32 2147483648, %v1756_v18  ;;  %vm955_vm1 = vcmp.eq.f32.partialorder %v2018_v54, inf }
 0x1c3   :  { %v1059_v58 = vmul.f32 %v1043_v0, %v1027_v5  ;;  %v983_v38 = vsel %vm981_vm15, %v982_v31, %v980_v7  ;;  %v952_v39 = vsub.f32 1.5, %v951_v42  ;;  %v1062_v23 = vmul.f32 %v1046_v30, %v1030_v24 }
 0x1c4   :  { %v999_v49 = vsub.f32 %v743_v13, %v983_v38  ;;  %v716_v52 = vsel %vm715_vm0, %v1756_v18, %v714_v56  ;;  %v958_v63 = vand.u32 2147483648, %v2018_v54  ;;  %vm717_vm2 = vcmp.eq.f32.partialorder %v1756_v18, 0.0 }
 0x1c5   :  { %1076 = vst.msk [vmem:[%s2116_s7 + $0x58] sm:$0xff] %vm1064_vm7, %v1059_v58  ;;  %v953_v48 = vmul.f32 %v1202_v46, %v952_v39  ;;  %vm957_vm3 = vcmp.eq.f32.partialorder %v2018_v54, 0.0  ;;  %v719_v55 = vsel %vm717_vm2, %v718_v11, %v716_v52 }
 0x1c6   :  { %1079 = vst.msk [vmem:[%s2116_s7 + $0x70] sm:$0xff] %vm1064_vm7, %v1062_v23  ;;  %v1015_v41 = vadd.f32 1.0, %v999_v49 }
 0x1c7   :  { %v954_v33 = vmul.f32 %v953_v48, %v2018_v54 }
 0x1c8   :  { %v1031_v51 = vmax.f32 %v1015_v41, 0.0 }
 0x1c9   :  { %v956_v27 = vsel %vm955_vm1, %v2018_v54, %v954_v33 }
 0x1ca   :  { %v1063_v19 = vmul.f32 %v1047_v20, %v1031_v51  ;;  %v959_v61 = vsel %vm957_vm3, %v958_v63, %v956_v27 }
 0x1cb   :  { %v997_v62 = vsub.f32 %v719_v55, %v959_v61 }
 0x1cc   :  { %1080 = vst.msk [vmem:[%s2116_s7 + $0x78] sm:$0xff] %vm1064_vm7, %v1063_v19 }
 0x1cd   :  { %v1013_v2 = vadd.f32 1.0, %v997_v62 }
 0x1cf   :  { %v1029_v26 = vmax.f32 %v1013_v2, 0.0 }
 0x1d1   :  { %v1061_v18 = vmul.f32 %v1045_v44, %v1029_v26 }
 0x1d3   :  { %1078 = vst.msk [vmem:[%s2116_s7 + $0x68] sm:$0xff] %vm1064_vm7, %v1061_v18 }

</bundles_post_ra>
